<compile_context>
chip_gen: v7x
topology: tpu7x:2x2x1
jax: 0.10.0
libtpu: 0.0.40
codegen_flags: <defaults>
</compile_context>

<pallas_src>
import functools

import numpy as np
import jax
import jax.numpy as jnp
from jax.experimental import pallas as pl
from jax.experimental.pallas import tpu as pltpu


# ----------------------------------------------------------------------------
# Kernel: per-row-block MAP decision via the folded symmetric discriminant.
# ----------------------------------------------------------------------------
def _map_kernel(coef_ref, main_ref, halo_ref, out_ref, *, K):
    """d(y) = y^T A y + b^T y + c ;  pred = (d > 0).

    coef_ref : SMEM f32[K + K(K-1)/2 + K + 1]
        [0:K)                diag(A)
        [K:K+K(K-1)/2)       2*A[k,l] for k < l (row-major upper triangle)
        [..:..+K)            b
        [last]               c  (folds mu^T IC mu terms, logdets, log priors)
    main_ref : VMEM f32[R, T]    window tap 0 for every output element
    halo_ref : VMEM f32[R, 128]  the next 2L samples after each row chunk
    out_ref  : VMEM f32[R, T]    0/1 predictions
    """
    main = main_ref[...]                                   # (R, T)
    halo = halo_ref[...]                                   # (R, 128)
    T = main.shape[1]

    # Extended row [chunk | halo]; taps k = 0..K-1 are static lane-shifted views.
    ext = jnp.concatenate([main, halo], axis=-1)           # (R, T + 128)
    taps = [main] + [ext[:, k:k + T] for k in range(1, K)]

    off_od = K
    off_b = K + (K * (K - 1)) // 2
    off_c = off_b + K

    acc = None
    idx = off_od
    for k in range(K):
        # b_k + A_kk * y_k + sum_{l>k} (2 A_kl) * y_l
        term = coef_ref[off_b + k] + coef_ref[k] * taps[k]
        for l in range(k + 1, K):
            term = term + coef_ref[idx] * taps[l]
            idx += 1
        contrib = taps[k] * term
        acc = contrib if acc is None else acc + contrib

    d = acc + coef_ref[off_c]
    out_ref[...] = (d > 0).astype(jnp.float32)


# ----------------------------------------------------------------------------
# Tiling helpers.
# ----------------------------------------------------------------------------
def _pick_chunk(S, max_chunk=512):
    assert S % 128 == 0, "S must be a multiple of 128"
    chunk = 128
    for c in range(128, min(S, max_chunk) + 1, 128):
        if S % c == 0:
            chunk = c
    return chunk


def _pick_block_rows(n_rows, chunk, target_bytes=512 * 1024):
    cands = [r for r in range(8, n_rows + 1, 8) if n_rows % r == 0]
    if not cands:
        return n_rows                       # tiny case: block == full row dim
    cap = max(8, target_bytes // (chunk * 4))
    good = [r for r in cands if r <= cap]
    r = max(good) if good else min(cands)
    if r == n_rows:                         # prefer >= 2 grid steps if possible
        smaller = [c for c in good if c < n_rows]
        if smaller:
            r = max(smaller)
    return r


# ----------------------------------------------------------------------------
# Wrapper: reflect-pad + row flattening in JAX, hot path in the Pallas kernel.
# ----------------------------------------------------------------------------
def local_map_forward(Y, coef, L=3, chunk=None, block_rows=None):
    """Y: [B, S] float32 -> preds: [B, S] float32 (0.0 / 1.0)."""
    B, S = Y.shape
    K = 2 * L + 1
    HALO = 2 * L
    assert HALO <= 128

    if chunk is None:
        chunk = _pick_chunk(S)
    assert chunk % 128 == 0 and S % chunk == 0

    n_chunks = S // chunk
    n_rows = B * n_chunks
    if block_rows is None:
        block_rows = _pick_block_rows(n_rows, chunk)
    assert n_rows % block_rows == 0

    # Reflect pad once (matches torch F.pad mode='reflect'); no [K,B,S] stack.
    Yp = jnp.pad(Y, ((0, 0), (L, L)), mode="reflect")            # [B, S + 2L]

    # Row (b, t) holds Yp[b, t*chunk : (t+1)*chunk]  (== tap 0 for that chunk).
    main = Yp[:, :S].reshape(n_rows, chunk)                      # [n_rows, chunk]

    # 2L-sample halo following each chunk, zero-padded to a 128-lane slab.
    halo = jnp.stack(
        [Yp[:, (t + 1) * chunk:(t + 1) * chunk + HALO] for t in range(n_chunks)],
        axis=1).reshape(n_rows, HALO)                            # [n_rows, 2L]
    halo = jnp.pad(halo, ((0, 0), (0, 128 - HALO)))              # [n_rows, 128]

    smem_spec = pl.BlockSpec(memory_space=pltpu.MemorySpace.SMEM)
    grid_spec = pltpu.PrefetchScalarGridSpec(
        num_scalar_prefetch=0,
        grid=(n_rows // block_rows,),
        in_specs=[
            smem_spec,                                           # coef (flat)
            pl.BlockSpec((block_rows, chunk), lambda i: (i, 0)),  # main
            pl.BlockSpec((block_rows, 128), lambda i: (i, 0)),    # halo
        ],
        out_specs=pl.BlockSpec((block_rows, chunk), lambda i: (i, 0)),
    )

    out_flat = pl.pallas_call(
        functools.partial(_map_kernel, K=K),
        out_shape=jax.ShapeDtypeStruct((n_rows, chunk), jnp.float32),
        grid_spec=grid_spec,
        compiler_params=pltpu.CompilerParams(
            dimension_semantics=("parallel",),
            vmem_limit_bytes=32 * 1024 * 1024),
    )(coef, main, halo)

    return out_flat.reshape(B, n_chunks, chunk).reshape(B, S)


# ----------------------------------------------------------------------------
# Deterministic "training" statistics mirroring the module's __init__,
# folded into the single-discriminant coefficient vector.
# ----------------------------------------------------------------------------
def build_params(X_np, Y_np, L=3, eps=1e-5):
    """X_np: [N, S] binary, Y_np: [N, S] float. Returns (coef, raw_stats)."""
    # TODO(synk): np.cov / inv / slogdet stay host-side (no Pallas equivalent),
    # exactly as the original module computes them outside forward().
    N, S = X_np.shape
    K = 2 * L + 1
    Yp = np.pad(Y_np, ((0, 0), (L, L)), mode="reflect")
    Y_local = np.stack([Yp[:, k:k + S] for k in range(K)], axis=-1)  # [N, S, K]
    Y_flat = Y_local.reshape(-1, K).astype(np.float64)
    X_flat = X_np.reshape(-1)

    Y0 = Y_flat[X_flat == 0]
    Y1 = Y_flat[X_flat == 1]
    mu0 = Y0.mean(axis=0)
    mu1 = Y1.mean(axis=0)
    cov0 = np.cov(Y0.T, bias=True) + np.eye(K) * eps
    cov1 = np.cov(Y1.T, bias=True) + np.eye(K) * eps
    ic0 = np.linalg.inv(cov0)
    ic1 = np.linalg.inv(cov1)
    _, ld0 = np.linalg.slogdet(cov0)
    _, ld1 = np.linalg.slogdet(cov1)

    c0 = float((X_flat == 0).sum())
    c1 = float((X_flat == 1).sum())
    total = c0 + c1 + 1e-8
    lp0 = np.log(max(c0 / total, 1e-8))
    lp1 = np.log(max(c1 / total, 1e-8))

    # Folded discriminant: d(y) = y^T A y + b^T y + c ;  pred = (d > 0).
    A = -0.5 * (ic1 - ic0)
    b = ic1 @ mu1 - ic0 @ mu0
    c = (-0.5 * (mu1 @ ic1 @ mu1 - mu0 @ ic0 @ mu0)
         - 0.5 * (ld1 - ld0) + (lp1 - lp0))

    coef = np.empty(K + K * (K - 1) // 2 + K + 1, np.float32)
    coef[:K] = np.diag(A)
    idx = K
    for k in range(K):
        for l in range(k + 1, K):
            coef[idx] = 2.0 * A[k, l]
            idx += 1
    coef[idx:idx + K] = b
    coef[idx + K] = c

    stats = dict(mu0=mu0, mu1=mu1, ic0=ic0, ic1=ic1,
                 ld0=ld0, ld1=ld1, lp0=lp0, lp1=lp1)
    return jnp.asarray(coef), stats


# Pure-JAX reference of the original forward pass (correctness check only).
def reference_forward(Y, stats, L=3):
    B, S = Y.shape
    K = 2 * L + 1
    mu0 = jnp.asarray(stats["mu0"], jnp.float32)
    mu1 = jnp.asarray(stats["mu1"], jnp.float32)
    ic0 = jnp.asarray(stats["ic0"], jnp.float32)
    ic1 = jnp.asarray(stats["ic1"], jnp.float32)
    Yp = jnp.pad(Y, ((0, 0), (L, L)), mode="reflect")
    Yl = jnp.stack([Yp[:, k:k + S] for k in range(K)], axis=-1)      # [B, S, K]

    def log_mv(mu, ic, logdet, log_prior):
        delta = Yl - mu
        mahal = jnp.einsum("bsk,kl,bsl->bs", delta, ic, delta)
        return -0.5 * mahal - 0.5 * logdet + log_prior

    logp0 = log_mv(mu0, ic0, float(stats["ld0"]), float(stats["lp0"]))
    logp1 = log_mv(mu1, ic1, float(stats["ld1"]), float(stats["lp1"]))
    d = logp1 - logp0
    return (d > 0).astype(jnp.float32), d


if __name__ == "__main__":
    L = 3
    B, S = 8, 1024            # inference input shape
    N_train, S_train = 16, 512  # synthetic "training" set for the __init__ stats

    key = jax.random.PRNGKey(0)
    k1, k2, k3, k4 = jax.random.split(key, 4)

    # Synthetic training data: binary X, observations Y = X + noise.
    X_train = (jax.random.uniform(k1, (N_train, S_train)) > 0.5).astype(jnp.float32)
    Y_train = X_train + 0.3 * jax.random.normal(k2, (N_train, S_train))

    coef, stats = build_params(np.asarray(X_train),
                               np.asarray(Y_train, dtype=np.float64), L=L)

    # Inference input.
    X_test = (jax.random.uniform(k3, (B, S)) > 0.5).astype(jnp.float32)
    Y = (X_test + 0.3 * jax.random.normal(k4, (B, S))).astype(jnp.float32)

    preds = jax.block_until_ready(local_map_forward(Y, coef, L=L))
    assert preds.shape == (B, S) and preds.dtype == jnp.float32

    ref_preds, ref_d = reference_forward(Y, stats, L=L)
    ref_preds = np.asarray(jax.block_until_ready(ref_preds))
    ref_d = np.asarray(jax.block_until_ready(ref_d))

    preds_np = np.asarray(preds)
    mismatch = preds_np != ref_preds
    # The thresholded 0/1 output may only disagree where the log-posterior
    # margin is ~0 (different but equivalent summation order).
    assert np.all(np.abs(ref_d[mismatch]) < 1e-3), (
        f"{int(mismatch.sum())} mismatches away from the decision boundary")

    print("KERNEL_OK")
</pallas_src>

<mosaic_0001>
module attributes {stable_mosaic.version = 11 : i64} {
  func.func @_map_kernel(%arg0: i32, %arg1: memref<36xf32, #tpu.memory_space<smem>>, %arg2: memref<8x512xf32, #tpu.memory_space<vmem>>, %arg3: memref<8x128xf32, #tpu.memory_space<vmem>>, %arg4: memref<8x512xf32, #tpu.memory_space<vmem>>) attributes {dimension_semantics = [#tpu.dimension_semantics<parallel>], iteration_bounds = array<i64: 2>, scalar_prefetch = 0 : i64, scratch_operands = 0 : i64, tpu.core_type = #tpu.core_type<tc>, window_params = [{transform_indices = @transform_0, window_bounds = array<i64: 36>}, {transform_indices = @transform_1, window_bounds = array<i64: 8, 512>}, {transform_indices = @transform_2, window_bounds = array<i64: 8, 128>}, {transform_indices = @transform_3, window_bounds = array<i64: 8, 512>}]} {
    %c0 = arith.constant 0 : index
    %c0_0 = arith.constant 0 : index
    %0 = vector.load %arg2[%c0, %c0_0] : memref<8x512xf32, #tpu.memory_space<vmem>>, vector<8x512xf32>
    %c0_1 = arith.constant 0 : index
    %c0_2 = arith.constant 0 : index
    %1 = vector.load %arg3[%c0_1, %c0_2] : memref<8x128xf32, #tpu.memory_space<vmem>>, vector<8x128xf32>
    %2 = tpu.concatenate %0, %1 in 1 : vector<8x512xf32>, vector<8x128xf32> -> vector<8x640xf32>
    %3 = vector.extract_strided_slice %2 {offsets = [0, 1], sizes = [8, 512], strides = [1, 1]} : vector<8x640xf32> to vector<8x512xf32>
    %4 = vector.extract_strided_slice %2 {offsets = [0, 2], sizes = [8, 512], strides = [1, 1]} : vector<8x640xf32> to vector<8x512xf32>
    %5 = vector.extract_strided_slice %2 {offsets = [0, 3], sizes = [8, 512], strides = [1, 1]} : vector<8x640xf32> to vector<8x512xf32>
    %6 = vector.extract_strided_slice %2 {offsets = [0, 4], sizes = [8, 512], strides = [1, 1]} : vector<8x640xf32> to vector<8x512xf32>
    %7 = vector.extract_strided_slice %2 {offsets = [0, 5], sizes = [8, 512], strides = [1, 1]} : vector<8x640xf32> to vector<8x512xf32>
    %8 = vector.extract_strided_slice %2 {offsets = [0, 6], sizes = [8, 512], strides = [1, 1]} : vector<8x640xf32> to vector<8x512xf32>
    %c28 = arith.constant 28 : index
    %9 = memref.load %arg1[%c28] : memref<36xf32, #tpu.memory_space<smem>>
    %c0_3 = arith.constant 0 : index
    %10 = memref.load %arg1[%c0_3] : memref<36xf32, #tpu.memory_space<smem>>
    %11 = vector.broadcast %10 : f32 to vector<8x512xf32>
    %12 = arith.mulf %11, %0 : vector<8x512xf32>
    %13 = vector.broadcast %9 : f32 to vector<8x512xf32>
    %14 = arith.addf %13, %12 : vector<8x512xf32>
    %c7 = arith.constant 7 : index
    %15 = memref.load %arg1[%c7] : memref<36xf32, #tpu.memory_space<smem>>
    %16 = vector.broadcast %15 : f32 to vector<8x512xf32>
    %17 = arith.mulf %16, %3 : vector<8x512xf32>
    %18 = arith.addf %14, %17 : vector<8x512xf32>
    %c8 = arith.constant 8 : index
    %19 = memref.load %arg1[%c8] : memref<36xf32, #tpu.memory_space<smem>>
    %20 = vector.broadcast %19 : f32 to vector<8x512xf32>
    %21 = arith.mulf %20, %4 : vector<8x512xf32>
    %22 = arith.addf %18, %21 : vector<8x512xf32>
    %c9 = arith.constant 9 : index
    %23 = memref.load %arg1[%c9] : memref<36xf32, #tpu.memory_space<smem>>
    %24 = vector.broadcast %23 : f32 to vector<8x512xf32>
    %25 = arith.mulf %24, %5 : vector<8x512xf32>
    %26 = arith.addf %22, %25 : vector<8x512xf32>
    %c10 = arith.constant 10 : index
    %27 = memref.load %arg1[%c10] : memref<36xf32, #tpu.memory_space<smem>>
    %28 = vector.broadcast %27 : f32 to vector<8x512xf32>
    %29 = arith.mulf %28, %6 : vector<8x512xf32>
    %30 = arith.addf %26, %29 : vector<8x512xf32>
    %c11 = arith.constant 11 : index
    %31 = memref.load %arg1[%c11] : memref<36xf32, #tpu.memory_space<smem>>
    %32 = vector.broadcast %31 : f32 to vector<8x512xf32>
    %33 = arith.mulf %32, %7 : vector<8x512xf32>
    %34 = arith.addf %30, %33 : vector<8x512xf32>
    %c12 = arith.constant 12 : index
    %35 = memref.load %arg1[%c12] : memref<36xf32, #tpu.memory_space<smem>>
    %36 = vector.broadcast %35 : f32 to vector<8x512xf32>
    %37 = arith.mulf %36, %8 : vector<8x512xf32>
    %38 = arith.addf %34, %37 : vector<8x512xf32>
    %39 = arith.mulf %0, %38 : vector<8x512xf32>
    %c29 = arith.constant 29 : index
    %40 = memref.load %arg1[%c29] : memref<36xf32, #tpu.memory_space<smem>>
    %c1 = arith.constant 1 : index
    %41 = memref.load %arg1[%c1] : memref<36xf32, #tpu.memory_space<smem>>
    %42 = vector.broadcast %41 : f32 to vector<8x512xf32>
    %43 = arith.mulf %42, %3 : vector<8x512xf32>
    %44 = vector.broadcast %40 : f32 to vector<8x512xf32>
    %45 = arith.addf %44, %43 : vector<8x512xf32>
    %c13 = arith.constant 13 : index
    %46 = memref.load %arg1[%c13] : memref<36xf32, #tpu.memory_space<smem>>
    %47 = vector.broadcast %46 : f32 to vector<8x512xf32>
    %48 = arith.mulf %47, %4 : vector<8x512xf32>
    %49 = arith.addf %45, %48 : vector<8x512xf32>
    %c14 = arith.constant 14 : index
    %50 = memref.load %arg1[%c14] : memref<36xf32, #tpu.memory_space<smem>>
    %51 = vector.broadcast %50 : f32 to vector<8x512xf32>
    %52 = arith.mulf %51, %5 : vector<8x512xf32>
    %53 = arith.addf %49, %52 : vector<8x512xf32>
    %c15 = arith.constant 15 : index
    %54 = memref.load %arg1[%c15] : memref<36xf32, #tpu.memory_space<smem>>
    %55 = vector.broadcast %54 : f32 to vector<8x512xf32>
    %56 = arith.mulf %55, %6 : vector<8x512xf32>
    %57 = arith.addf %53, %56 : vector<8x512xf32>
    %c16 = arith.constant 16 : index
    %58 = memref.load %arg1[%c16] : memref<36xf32, #tpu.memory_space<smem>>
    %59 = vector.broadcast %58 : f32 to vector<8x512xf32>
    %60 = arith.mulf %59, %7 : vector<8x512xf32>
    %61 = arith.addf %57, %60 : vector<8x512xf32>
    %c17 = arith.constant 17 : index
    %62 = memref.load %arg1[%c17] : memref<36xf32, #tpu.memory_space<smem>>
    %63 = vector.broadcast %62 : f32 to vector<8x512xf32>
    %64 = arith.mulf %63, %8 : vector<8x512xf32>
    %65 = arith.addf %61, %64 : vector<8x512xf32>
    %66 = arith.mulf %3, %65 : vector<8x512xf32>
    %67 = arith.addf %39, %66 : vector<8x512xf32>
    %c30 = arith.constant 30 : index
    %68 = memref.load %arg1[%c30] : memref<36xf32, #tpu.memory_space<smem>>
    %c2 = arith.constant 2 : index
    %69 = memref.load %arg1[%c2] : memref<36xf32, #tpu.memory_space<smem>>
    %70 = vector.broadcast %69 : f32 to vector<8x512xf32>
    %71 = arith.mulf %70, %4 : vector<8x512xf32>
    %72 = vector.broadcast %68 : f32 to vector<8x512xf32>
    %73 = arith.addf %72, %71 : vector<8x512xf32>
    %c18 = arith.constant 18 : index
    %74 = memref.load %arg1[%c18] : memref<36xf32, #tpu.memory_space<smem>>
    %75 = vector.broadcast %74 : f32 to vector<8x512xf32>
    %76 = arith.mulf %75, %5 : vector<8x512xf32>
    %77 = arith.addf %73, %76 : vector<8x512xf32>
    %c19 = arith.constant 19 : index
    %78 = memref.load %arg1[%c19] : memref<36xf32, #tpu.memory_space<smem>>
    %79 = vector.broadcast %78 : f32 to vector<8x512xf32>
    %80 = arith.mulf %79, %6 : vector<8x512xf32>
    %81 = arith.addf %77, %80 : vector<8x512xf32>
    %c20 = arith.constant 20 : index
    %82 = memref.load %arg1[%c20] : memref<36xf32, #tpu.memory_space<smem>>
    %83 = vector.broadcast %82 : f32 to vector<8x512xf32>
    %84 = arith.mulf %83, %7 : vector<8x512xf32>
    %85 = arith.addf %81, %84 : vector<8x512xf32>
    %c21 = arith.constant 21 : index
    %86 = memref.load %arg1[%c21] : memref<36xf32, #tpu.memory_space<smem>>
    %87 = vector.broadcast %86 : f32 to vector<8x512xf32>
    %88 = arith.mulf %87, %8 : vector<8x512xf32>
    %89 = arith.addf %85, %88 : vector<8x512xf32>
    %90 = arith.mulf %4, %89 : vector<8x512xf32>
    %91 = arith.addf %67, %90 : vector<8x512xf32>
    %c31 = arith.constant 31 : index
    %92 = memref.load %arg1[%c31] : memref<36xf32, #tpu.memory_space<smem>>
    %c3 = arith.constant 3 : index
    %93 = memref.load %arg1[%c3] : memref<36xf32, #tpu.memory_space<smem>>
    %94 = vector.broadcast %93 : f32 to vector<8x512xf32>
    %95 = arith.mulf %94, %5 : vector<8x512xf32>
    %96 = vector.broadcast %92 : f32 to vector<8x512xf32>
    %97 = arith.addf %96, %95 : vector<8x512xf32>
    %c22 = arith.constant 22 : index
    %98 = memref.load %arg1[%c22] : memref<36xf32, #tpu.memory_space<smem>>
    %99 = vector.broadcast %98 : f32 to vector<8x512xf32>
    %100 = arith.mulf %99, %6 : vector<8x512xf32>
    %101 = arith.addf %97, %100 : vector<8x512xf32>
    %c23 = arith.constant 23 : index
    %102 = memref.load %arg1[%c23] : memref<36xf32, #tpu.memory_space<smem>>
    %103 = vector.broadcast %102 : f32 to vector<8x512xf32>
    %104 = arith.mulf %103, %7 : vector<8x512xf32>
    %105 = arith.addf %101, %104 : vector<8x512xf32>
    %c24 = arith.constant 24 : index
    %106 = memref.load %arg1[%c24] : memref<36xf32, #tpu.memory_space<smem>>
    %107 = vector.broadcast %106 : f32 to vector<8x512xf32>
    %108 = arith.mulf %107, %8 : vector<8x512xf32>
    %109 = arith.addf %105, %108 : vector<8x512xf32>
    %110 = arith.mulf %5, %109 : vector<8x512xf32>
    %111 = arith.addf %91, %110 : vector<8x512xf32>
    %c32 = arith.constant 32 : index
    %112 = memref.load %arg1[%c32] : memref<36xf32, #tpu.memory_space<smem>>
    %c4 = arith.constant 4 : index
    %113 = memref.load %arg1[%c4] : memref<36xf32, #tpu.memory_space<smem>>
    %114 = vector.broadcast %113 : f32 to vector<8x512xf32>
    %115 = arith.mulf %114, %6 : vector<8x512xf32>
    %116 = vector.broadcast %112 : f32 to vector<8x512xf32>
    %117 = arith.addf %116, %115 : vector<8x512xf32>
    %c25 = arith.constant 25 : index
    %118 = memref.load %arg1[%c25] : memref<36xf32, #tpu.memory_space<smem>>
    %119 = vector.broadcast %118 : f32 to vector<8x512xf32>
    %120 = arith.mulf %119, %7 : vector<8x512xf32>
    %121 = arith.addf %117, %120 : vector<8x512xf32>
    %c26 = arith.constant 26 : index
    %122 = memref.load %arg1[%c26] : memref<36xf32, #tpu.memory_space<smem>>
    %123 = vector.broadcast %122 : f32 to vector<8x512xf32>
    %124 = arith.mulf %123, %8 : vector<8x512xf32>
    %125 = arith.addf %121, %124 : vector<8x512xf32>
    %126 = arith.mulf %6, %125 : vector<8x512xf32>
    %127 = arith.addf %111, %126 : vector<8x512xf32>
    %c33 = arith.constant 33 : index
    %128 = memref.load %arg1[%c33] : memref<36xf32, #tpu.memory_space<smem>>
    %c5 = arith.constant 5 : index
    %129 = memref.load %arg1[%c5] : memref<36xf32, #tpu.memory_space<smem>>
    %130 = vector.broadcast %129 : f32 to vector<8x512xf32>
    %131 = arith.mulf %130, %7 : vector<8x512xf32>
    %132 = vector.broadcast %128 : f32 to vector<8x512xf32>
    %133 = arith.addf %132, %131 : vector<8x512xf32>
    %c27 = arith.constant 27 : index
    %134 = memref.load %arg1[%c27] : memref<36xf32, #tpu.memory_space<smem>>
    %135 = vector.broadcast %134 : f32 to vector<8x512xf32>
    %136 = arith.mulf %135, %8 : vector<8x512xf32>
    %137 = arith.addf %133, %136 : vector<8x512xf32>
    %138 = arith.mulf %7, %137 : vector<8x512xf32>
    %139 = arith.addf %127, %138 : vector<8x512xf32>
    %c34 = arith.constant 34 : index
    %140 = memref.load %arg1[%c34] : memref<36xf32, #tpu.memory_space<smem>>
    %c6 = arith.constant 6 : index
    %141 = memref.load %arg1[%c6] : memref<36xf32, #tpu.memory_space<smem>>
    %142 = vector.broadcast %141 : f32 to vector<8x512xf32>
    %143 = arith.mulf %142, %8 : vector<8x512xf32>
    %144 = vector.broadcast %140 : f32 to vector<8x512xf32>
    %145 = arith.addf %144, %143 : vector<8x512xf32>
    %146 = arith.mulf %8, %145 : vector<8x512xf32>
    %147 = arith.addf %139, %146 : vector<8x512xf32>
    %c35 = arith.constant 35 : index
    %148 = memref.load %arg1[%c35] : memref<36xf32, #tpu.memory_space<smem>>
    %149 = vector.broadcast %148 : f32 to vector<8x512xf32>
    %150 = arith.addf %147, %149 : vector<8x512xf32>
    %cst = arith.constant 0.000000e+00 : f32
    %151 = vector.broadcast %cst : f32 to vector<8x512xf32>
    %152 = arith.cmpf ogt, %150, %151 : vector<8x512xf32>
    %153 = arith.extui %152 : vector<8x512xi1> to vector<8x512xi32>
    %154 = arith.sitofp %153 : vector<8x512xi32> to vector<8x512xf32>
    %c0_4 = arith.constant 0 : index
    %c0_5 = arith.constant 0 : index
    %155 = vector.load %arg4[%c0_4, %c0_5] : memref<8x512xf32, #tpu.memory_space<vmem>>, vector<8x512xf32>
    tpu.vector_store %arg4[%c0_4, %c0_5], %154 {strides = array<i32>} : memref<8x512xf32, #tpu.memory_space<vmem>>, vector<8x512xf32>,
    return
  }
  func.func @transform_0(%arg0: i32) -> i32 {
    %c0_i32 = arith.constant 0 : i32
    %c0_i32_0 = arith.constant 0 : i32
    return %c0_i32 : i32
  }
  func.func @transform_1(%arg0: i32) -> (i32, i32) {
    %c0_i32 = arith.constant 0 : i32
    %c0_i32_0 = arith.constant 0 : i32
    return %arg0, %c0_i32 : i32, i32
  }
  func.func @transform_2(%arg0: i32) -> (i32, i32) {
    %c0_i32 = arith.constant 0 : i32
    %c0_i32_0 = arith.constant 0 : i32
    return %arg0, %c0_i32 : i32, i32
  }
  func.func @transform_3(%arg0: i32) -> (i32, i32) {
    %c0_i32 = arith.constant 0 : i32
    %c0_i32_0 = arith.constant 0 : i32
    return %arg0, %c0_i32 : i32, i32
  }
}

</mosaic_0001>

<bundles_post_ra>
// kernel: tpu_custom_call.1
= control target key start
LH: loop header
LB: loop body
LE: loop exit
PB: predicated region body
PF: predicated region fallthrough
CT: control target
= control target key end

     0   :  { %8 = vsyncpa [#allocation5], 0  ;;  %s2622_s0 = inlined_call_operand.hbm [shape: f32[36], index: 0, kind: input, shape index: {}]   ;;  %s2623_s1 = inlined_call_operand.hbm [shape: f32[16,512], index: 1, kind: input, shape index: {}]   ;;  %s2624_s2 = inlined_call_operand.hbm [shape: f32[16,128], index: 2, kind: input, shape index: {}]   ;;  %s2625_s3 = inlined_call_operand.hbm [shape: f32[16,512], index: 3, kind: output, shape index: {}]  }
   0x1   :  { %9 = vsyncpa [#allocation3], 0 }
   0x2   :  { %11 = vsyncpa [#allocation3 + $0x1], 0 }
   0x3   :  { %12 = vsyncpa [#allocation8], 0 }
   0x4   :  { %14 = vsyncpa [#allocation8 + $0x1], 0 }
   0x5   :  { %15 = vsyncpa [#allocation4], 0 }
   0x6   :  { %17 = vsyncpa [#allocation4 + $0x1], 0  ;;  %s1739_s12 = smov 0   ;;  %s1741_s13 = smov 0  }
   0x7   :  { %s1743_s14 = smov 0   ;;  %s1745_s15 = smov 0  }
   0x8 LB: > { %s1760_s16 = sadd.s32 4294967295, %s1706_s15   ;;  %s1425_s17 = sadd.s32 4294967294, %s1706_s15   ;;  %s1706_s15 = sphi %s1745_s15, %s2682_s15   ;;  %s1702_s14 = sphi %s1743_s14, %s2681_s14   ;;  %s1698_s13 = sphi %s1741_s13, %s2680_s13   ;;  %s1694_s12 = sphi %s1739_s12, %s2679_s12  }
   0x9   : > { %s1764_s18 = sadd.s32 1, %s1706_s15   ;;  %s51_s19 = sadd.s32 1, %s1702_s14 }
   0xa   : > { %s48_s20 = ssub.s32 %s1706_s15, %s1764_s18  ;;  %p58_p0 = scmp.ne.s32.totalorder %s1702_s14, %s1698_s13 }
   0xb   : > { %p49_p1 = scmp.eq.s32.totalorder %s48_s20, 0  ;;  %p64_p2 = scmp.ne.s32.totalorder %s1698_s13, %s1694_s12 }
   0xc   : > { %p2626_p3 = scmp.eq.s32.totalorder %s1760_s16, 0  ;;  %p114_p4 = scmp.eq.s32.totalorder %s1760_s16, 1 }
   0xd   : > { %s1776_s21 = scalar_select %p49_p1, %s1702_s14, %s51_s19  }
   0xe   : > { %p1780_p5 = por %p2626_p3, %p64_p2  ;;  %p1787_p6 = por %p114_p4, %p58_p0 }
   0xf   : > { %p120_p7 = scmp.eq.s32.totalorder %s1425_s17, 1  ;;  %p1426_p8 = scmp.ge.s32.totalorder %s1706_s15, 1 }
  0x10   : > { %s2637_s22 = scalar_select %p1780_p5, 1, 0 }
  0x11   : > { %s2638_s23 = scalar_select %p1787_p6, 1, 0 }
  0x12   : > { %p127_p9 = scmp.lt.s32.totalorder %s1706_s15, 3  ;;  %p1793_p10 = por %p120_p7, %p64_p2 }
  0x13   : > { %p59_p13 = scmp.eq.s32.totalorder %s1706_s15, 0  ;;  %p1511_p1 = scmp.lt.s32.totalorder %s1706_s15, 2 }
  0x14   : > { %s2639_s24 = scalar_select %p1793_p10, 1, 0 }
  0x15   : > { %p1797_p11 = pnand %p1426_p8, %p127_p9  ;;  %s1807_s26 = sand.u32 1, %s1702_s14  }
  0x16   : > { %p1812_p3 = por %p59_p13, %p58_p0  ;;  %p2642_p2 = scmp.eq.s32.totalorder %s1760_s16, 0 }
  0x17   : > { %s2640_s25 = scalar_select %p1797_p11, 1, 0 }
  0x18   : > { %p1495_p4 = pneg %p1797_p11  ;;  %s1429_s28 = sshll.u32 %s1807_s26, 5 }
  0x19   : > { %s1483_s29 = sshll.u32 %s1706_s15, 9  ;;  %s1559_s8 = scalar_lea.hbm %s2622_s0, 16 }
  0x1a   : > { %p1496_p7 = pnand %p1495_p4, %p2642_p2  ;;  %s1823_s5 = scalar_lea.hbm %s2623_s1, %s1483_s29 }
  0x1b   : > { %p1560_p0 = scmp.ne.s32.totalorder %s2622_s0, %s1559_s8  ;;  %p1566_p4 = scmp.lt.u32.totalorder %s1559_s8, %s2622_s0 }
  0x1c   : > { %p1561_p8 = pneg %p1496_p7 }
  0x1e   : > { %p1562_p9 = pnand %p1561_p8, %p1560_p0 }
  0x20   : > { %p1563_p13 = pneg %p1562_p9 }
  0x22   : > { %p1568_p2 = pnand %p1566_p4, %p1563_p13 }
  0x24   : > { %1571 = shalt.err (!%p1568_p2)
}
  0x25   : > { %s1708_s19 = smov [#allocation2]   ;;  %s153_s30 = scalar_lea.vmem [#allocation6], %s1429_s28 }
  0x26   : > { %1498 = dma.hbm_to_smem (!%p1496_p7), %s2622_s0, 16, %s1708_s19, [#allocation5]  }
  0x27   : > { %s161_s4 = sshll.u32 %s153_s30, 4  ;;  %p1841_p0 = pnand %p1511_p1, %p1812_p3  ;;  %s1845_s4 = int_to_ptr.vmem [resolvable:$true] %s161_s4 }
  0x28   : > { %s1432_s7 = sshll.u32 %s1807_s26, 3  ;;  %s150_s8 = scalar_lea.sflag [#allocation3], %s1807_s26 }
  0x29   : > { %s1572_s9 = scalar_lea.hbm %s1823_s5, 512  ;;  %p1574_p9 = pneg %p1841_p0 }
  0x2a   : > { %p1573_p8 = scmp.ne.s32.totalorder %s1823_s5, %s1572_s9  ;;  %s1577_s10 = scalar_lea.hbm %s2623_s1, 1024 }
  0x2b   : > { %p1578_p3 = scmp.lt.u32.totalorder %s1823_s5, %s2623_s1  ;;  %p1579_p1 = scmp.lt.u32.totalorder %s1577_s10, %s1572_s9 }
  0x2c   : > { %p1575_p7 = pnand %p1574_p9, %p1573_p8  ;;  %p1581_p2 = scmp.lt.u32.totalorder %s1572_s9, %s1823_s5 }
  0x2d   : > { %p1580_p4 = por %p1579_p1, %p1578_p3 }
  0x2e   : > { %p1576_p13 = pneg %p1575_p7 }
  0x2f   : > { %p1582_p12 = por %p1581_p2, %p1580_p4 }
  0x31   : > { %p1583_p10 = pnand %p1582_p12, %p1576_p13 }
  0x33   : > { %1586 = shalt.err (!%p1583_p10)
}
  0x34   : > { %s1587_s19 = scalar_lea.vmem %s1845_s4, 512  ;;  %s1709_s20 = smov [#allocation6]  }
  0x35   : > { %p1588_p8 = scmp.ne.s32.totalorder %s1845_s4, %s1587_s19  ;;  %s1592_s29 = sshll.u32 %s1709_s20, 4  ;;  %s1593_s29 = int_to_ptr.vmem [resolvable:$false] %s1592_s29 }
  0x36   : > { %s1594_s30 = scalar_lea.vmem %s1593_s29, 1024  ;;  %p1595_p5 = scmp.lt.s32.totalorder %s1845_s4, %s1593_s29 }
  0x37   : > { %p1590_p7 = pnand %p1588_p8, %p1574_p9  ;;  %p1596_p3 = scmp.lt.s32.totalorder %s1594_s30, %s1587_s19 }
  0x39   : > { %p1591_p6 = pneg %p1590_p7  ;;  %p1597_p1 = por %p1596_p3, %p1595_p5 }
  0x3b   : > { %p1598_p4 = pnand %p1597_p1, %p1591_p6 }
  0x3d   : > { %1601 = shalt.err (!%p1598_p4)
}
  0x3e   : > { %1502 = dma.hbm_to_vmem [thread:$0]  (!%p1841_p0), %s1823_s5, 512, %s1845_s4, %s150_s8  }
  0x3f   : > { %s1433_s9 = sshll.u32 %s1706_s15, 7  ;;  %s172_s11 = scalar_lea.vmem [#allocation7], %s1432_s7 }
  0x40   : > { %s1878_s10 = scalar_lea.hbm %s2624_s2, %s1433_s9  ;;  %s179_s17 = sshll.u32 %s172_s11, 4  ;;  %s180_s17 = int_to_ptr.vmem [resolvable:$true] %s179_s17 }
  0x41   : > { %s169_s19 = scalar_lea.sflag [#allocation8], %s1807_s26  ;;  %s1602_s20 = scalar_lea.hbm %s1878_s10, 128 }
  0x42   : > { %p1603_p5 = scmp.ne.s32.totalorder %s1878_s10, %s1602_s20  ;;  %s1607_s8 = scalar_lea.hbm %s2624_s2, 256 }
  0x43   : > { %p1608_p12 = scmp.lt.u32.totalorder %s1878_s10, %s2624_s2  ;;  %p1609_p13 = scmp.lt.u32.totalorder %s1607_s8, %s1602_s20 }
  0x44   : > { %p1605_p6 = pnand %p1603_p5, %p1574_p9  ;;  %p1611_p8 = scmp.lt.u32.totalorder %s1602_s20, %s1878_s10 }
  0x45   : > { %p1610_p2 = por %p1609_p13, %p1608_p12 }
  0x46   : > { %p1606_p10 = pneg %p1605_p6 }
  0x47   : > { %p1612_p7 = por %p1611_p8, %p1610_p2 }
  0x49   : > { %p1613_p3 = pnand %p1612_p7, %p1606_p10 }
  0x4b   : > { %1616 = shalt.err (!%p1613_p3)
}
  0x4c   : > { %s1617_s26 = scalar_lea.vmem %s180_s17, 128  ;;  %s1710_s7 = smov [#allocation7]  }
  0x4d   : > { %p1618_p1 = scmp.ne.s32.totalorder %s180_s17, %s1617_s26  ;;  %s1622_s9 = sshll.u32 %s1710_s7, 4  ;;  %s1623_s9 = int_to_ptr.vmem [resolvable:$false] %s1622_s9 }
  0x4e   : > { %s1624_s27 = scalar_lea.vmem %s1623_s9, 256  ;;  %p1625_p6 = scmp.lt.s32.totalorder %s180_s17, %s1623_s9 }
  0x4f   : > { %p1620_p4 = pnand %p1618_p1, %p1574_p9  ;;  %p1626_p11 = scmp.lt.s32.totalorder %s1624_s27, %s1617_s26 }
  0x51   : > { %p1621_p5 = pneg %p1620_p4  ;;  %p1627_p12 = por %p1626_p11, %p1625_p6 }
  0x53   : > { %p1628_p13 = pnand %p1627_p12, %p1621_p5 }
  0x55   : > { %1631 = shalt.err (!%p1628_p13)
}
  0x56   : > { %1505 = dma.hbm_to_vmem [thread:$0]  (!%p1841_p0), %s1878_s10, 128, %s180_s17, %s169_s19  }
  0x57   : > { %p2644_p10 = scmp.ne.s32.totalorder %s2640_s25, 0 }
  0x59   : > { %188 = sbr.rel (%p2644_p10) target bundleno = 700 (0x2bc), region = 32 }
  0x60   : > { %p2645_p2 = scmp.eq.s32.totalorder %s1760_s16, 0 }
  0x62   : > { %1677 = dma.done.wait (%p2645_p2), [#allocation5], 16   ;;  %p2646_p9 = pmov %p2645_p2 }
  0x63   : > { %s1909_s28 = sand.u32 1, %s1698_s13   ;;  %p2647_p11 = scmp.ne.s32.totalorder %s2637_s22, 0 }
  0x64   : > { %1679 = vsyncadd (%p2646_p9), [#allocation5], 4294967280  ;;  %s1436_s11 = sshll.u32 %s1909_s28, 5  ;;  %s195_s6 = scalar_lea.sflag [#allocation3], %s1909_s28 }
  0x65   : > { %s1915_s10 = scalar_lea.vmem [#allocation6], %s1436_s11 }
  0x66   : > { %1681 = dma.done.wait (%p2647_p11), %s195_s6, 512  }
  0x67   : > { %1683 = vsyncadd (%p2647_p11), %s195_s6, 4294966784  ;;  %s1437_s25 = sshll.u32 %s1909_s28, 3  ;;  %s204_s17 = scalar_lea.sflag [#allocation8], %s1909_s28 }
  0x68   : > { %s1923_s19 = scalar_lea.vmem [#allocation7], %s1437_s25 }
  0x69   : > { %1685 = dma.done.wait (%p2647_p11), %s204_s17, 128  }
  0x6a   : > { %1687 = vsyncadd (%p2647_p11), %s204_s17, 4294967168 }
  0x6b   : > { %212 = sfence }
  0x6c   : > { %s1440_s20 = sld [smem:[#allocation2 + $0x7]]  ;;  %s1441_s5 = sld [smem:[#allocation2 + $0x8]]  ;;  %v1930_v0 = vld [vmem:[%s1915_s10 + $0x10] sm:$0xff]  ;;  %v1933_v1 = vld [vmem:[%s1915_s10] sm:$0xff]  ;;  %v1936_v3 = vld [vmem:[%s1915_s10 + $0x18] sm:$0xff]  ;;  %vm275_vm0 = vcmask 1039360  }
  0x6d   : > { %v1939_v4 = vld [vmem:[%s1915_s10 + $0x8] sm:$0xff]  ;;  %s1711_s22 = smov 127   ;;  %s1442_s4 = sld [smem:[#allocation2 + $0x9]]  ;;  %vm310_vm1 = vcmask 1031168   ;;  %vm345_vm2 = vcmask 1022976   ;;  %vm380_vm3 = vcmask 1014784  }
  0x6e   : > { %v1948_v10 = vld [vmem:[%s1923_s19] sm:$0xff]  ;;  %s1712_s8 = smov 126   ;;  %s1443_s29 = sld [smem:[#allocation2 + $0xa]]  ;;  %vm415_vm4 = vcmask 1006592   ;;  %vm450_vm5 = vcmask 998400  }
  0x6f   : > { %s1713_s30 = smov 125   ;;  %s1444_s26 = sld [smem:[#allocation2 + $0xb]] }
  0x70   : > { %s1714_s7 = smov 124   ;;  %s1445_s9 = sld [smem:[#allocation2 + $0xc]] }
  0x71   : > { %s1715_s27 = smov 123   ;;  %s1448_s6 = sld [smem:[#allocation2 + $0xd]] }
  0x72   : > { %v254_v2 = vstv %s1440_s20  ;;  %v289_v9 = vstv %s1441_s5  ;;  %s1716_s25 = smov 122   ;;  %s1449_s17 = sld [smem:[#allocation2 + $0xe]] }
  0x73   : > { %v257_v5 = vmul.f32 %v254_v2, %v1930_v0  ;;  %v255_v6 = vmul.f32 %v254_v2, %v1933_v1  ;;  %v258_v7 = vmul.f32 %v254_v2, %v1936_v3  ;;  %v256_v8 = vmul.f32 %v254_v2, %v1939_v4  ;;  %s1450_s20 = sld [smem:[#allocation2 + $0xf]]  ;;  %s1451_s5 = sld [smem:[#allocation2 + $0x10]] }
  0x74   : > { %v290_v11 = vmul.f32 %v289_v9, %v1933_v1  ;;  %v259_v12 = vmul.f32 %v254_v2, %v1948_v10  ;;  %v292_v13 = vmul.f32 %v289_v9, %v1930_v0  ;;  %v291_v14 = vmul.f32 %v289_v9, %v1939_v4  ;;  %p2676_p8 = scmp.ne.s32.totalorder %s2638_s23, 0 }
  0x75   : > { %269 = vrot.lane.b32.xlu1 %v257_v5, %s1711_s22  ;;  %265 = vrot.lane.b32.xlu0 %v255_v6, %s1711_s22  ;;  %v294_v15 = vmul.f32 %v289_v9, %v1948_v10  ;;  %v293_v16 = vmul.f32 %v289_v9, %v1936_v3  ;;  %v324_v17 = vstv %s1442_s4  ;;  %v359_v22 = vstv %s1443_s29  ;;  %s1452_s4 = sld [smem:[#allocation2 + $0x11]]  ;;  %s1455_s29 = sld [smem:[#allocation2 + $0x12]] }
  0x76   : > { %v326_v18 = vmul.f32 %v324_v17, %v1939_v4  ;;  %v325_v19 = vmul.f32 %v324_v17, %v1933_v1  ;;  %v328_v20 = vmul.f32 %v324_v17, %v1936_v3  ;;  %v327_v21 = vmul.f32 %v324_v17, %v1930_v0 }
  0x77   : > { %v360_v23 = vmul.f32 %v359_v22, %v1933_v1  ;;  %v329_v24 = vmul.f32 %v324_v17, %v1948_v10  ;;  %v362_v25 = vmul.f32 %v359_v22, %v1930_v0  ;;  %v361_v26 = vmul.f32 %v359_v22, %v1939_v4 }
  0x78   : > { %v364_v27 = vmul.f32 %v359_v22, %v1948_v10  ;;  %v363_v28 = vmul.f32 %v359_v22, %v1936_v3  ;;  %v394_v29 = vstv %s1444_s26  ;;  %v429_v34 = vstv %s1445_s9  ;;  %s1456_s26 = sld [smem:[#allocation2 + $0x13]]  ;;  %s1447_s9 = sld [smem:[#allocation2 + $0x1]] }
  0x79   : > { %271 = vrot.lane.b32.xlu1 %v258_v7, %s1711_s22  ;;  %267 = vrot.lane.b32.xlu0 %v256_v8, %s1711_s22  ;;  %v396_v30 = vmul.f32 %v394_v29, %v1939_v4  ;;  %v395_v31 = vmul.f32 %v394_v29, %v1933_v1  ;;  %v398_v32 = vmul.f32 %v394_v29, %v1936_v3  ;;  %v482_v41 = vstv %s1448_s6  ;;  %s1446_s6 = sld [smem:[#allocation2 + $0x1d]] }
  0x7a   : > { %v397_v33 = vmul.f32 %v394_v29, %v1930_v0  ;;  %v430_v35 = vmul.f32 %v429_v34, %v1933_v1  ;;  %v399_v36 = vmul.f32 %v394_v29, %v1948_v10  ;;  %v432_v37 = vmul.f32 %v429_v34, %v1930_v0 }
  0x7b   : > { %v431_v38 = vmul.f32 %v429_v34, %v1939_v4  ;;  %v434_v39 = vmul.f32 %v429_v34, %v1948_v10  ;;  %v433_v40 = vmul.f32 %v429_v34, %v1936_v3  ;;  %v484_v42 = vmul.f32 %v482_v41, %v1939_v4 }
  0x7c   : > { %v483_v43 = vmul.f32 %v482_v41, %v1933_v1  ;;  %v486_v44 = vmul.f32 %v482_v41, %v1936_v3  ;;  %v485_v45 = vmul.f32 %v482_v41, %v1930_v0  ;;  %v518_v46 = vstv %s1449_s17  ;;  %s2151_s17 = sld [smem:[#allocation2 + $0x14]] }
  0x7d   : > { %300 = vrot.lane.b32.xlu1 %v290_v11, %s1712_s8  ;;  %273 = vrot.lane.b32.xlu0 %v259_v12, %s1711_s22  ;;  %v519_v47 = vmul.f32 %v518_v46, %v1933_v1  ;;  %v487_v48 = vmul.f32 %v482_v41, %v1948_v10  ;;  %v521_v49 = vmul.f32 %v518_v46, %v1930_v0  ;;  %v554_v53 = vstv %s1450_s20  ;;  %s1461_s20 = sld [smem:[#allocation2 + $0x16]] }
  0x7e   : > { %v520_v50 = vmul.f32 %v518_v46, %v1939_v4  ;;  %v523_v51 = vmul.f32 %v518_v46, %v1948_v10  ;;  %v522_v52 = vmul.f32 %v518_v46, %v1936_v3  ;;  %v556_v54 = vmul.f32 %v554_v53, %v1939_v4 }
  0x7f   : > { %v555_v55 = vmul.f32 %v554_v53, %v1933_v1  ;;  %v558_v56 = vmul.f32 %v554_v53, %v1936_v3  ;;  %v557_v57 = vmul.f32 %v554_v53, %v1930_v0  ;;  %v590_v58 = vstv %s1451_s5  ;;  %s1458_s5 = sld [smem:[#allocation2 + $0x15]] }
  0x80   : > { %v591_v59 = vmul.f32 %v590_v58, %v1933_v1  ;;  %v559_v60 = vmul.f32 %v554_v53, %v1948_v10  ;;  %v593_v61 = vmul.f32 %v590_v58, %v1930_v0  ;;  %v592_v62 = vmul.f32 %v590_v58, %v1939_v4 }
  0x81   : > { %304 = vrot.lane.b32.xlu1 %v292_v13, %s1712_s8  ;;  %302 = vrot.lane.b32.xlu0 %v291_v14, %s1712_s8  ;;  %v595_v63 = vmul.f32 %v590_v58, %v1948_v10  ;;  %v594_v2 = vmul.f32 %v590_v58, %v1936_v3  ;;  %v626_v5 = vstv %s1452_s4  ;;  %v708_v11 = vstv %s1455_s29  ;;  %s1462_s4 = sld [smem:[#allocation2 + $0x17]]  ;;  %s1463_s29 = sld [smem:[#allocation2 + $0x18]] }
  0x82   : > { %v628_v6 = vmul.f32 %v626_v5, %v1939_v4  ;;  %v627_v7 = vmul.f32 %v626_v5, %v1933_v1  ;;  %v630_v8 = vmul.f32 %v626_v5, %v1936_v3  ;;  %v629_v9 = vmul.f32 %v626_v5, %v1930_v0 }
  0x83   : > { %v631_v12 = vmul.f32 %v626_v5, %v1948_v10  ;;  %v710_v13 = vmul.f32 %v708_v11, %v1939_v4  ;;  %v709_v14 = vmul.f32 %v708_v11, %v1933_v1  ;;  %v711_v17 = vmul.f32 %v708_v11, %v1930_v0 }
  0x85   : > { %308 = vrot.lane.b32.xlu1 %v294_v15, %s1712_s8  ;;  %306 = vrot.lane.b32.xlu0 %v293_v16, %s1712_s8  ;;  %v712_v15 = vmul.f32 %v708_v11, %v1936_v3  ;;  %v744_v16 = vstv %s1456_s26  ;;  %s1466_s26 = sld [smem:[#allocation2 + $0x19]] }
  0x86   : > { %v747_v22 = vmul.f32 %v744_v16, %v1930_v0  ;;  %v748_v29 = vmul.f32 %v744_v16, %v1936_v3 }
  0x89   : > { %337 = vrot.lane.b32.xlu1 %v326_v18, %s1713_s30  ;;  %335 = vrot.lane.b32.xlu0 %v325_v19, %s1713_s30  ;;  %v745_v18 = vmul.f32 %v744_v16, %v1933_v1 }
  0x8d   : > { %341 = vrot.lane.b32.xlu1 %v328_v20, %s1713_s30  ;;  %339 = vrot.lane.b32.xlu0 %v327_v21, %s1713_s30  ;;  %v713_v21 = vmul.f32 %v708_v11, %v1948_v10  ;;  %v469_v11 = vstv %s1447_s9  ;;  %s1467_s9 = sld [smem:[#allocation2 + $0x1a]] }
  0x91   : > { %370 = vrot.lane.b32.xlu1 %v360_v23, %s1714_s7  ;;  %343 = vrot.lane.b32.xlu0 %v329_v24, %s1713_s30 }
  0x95   : > { %374 = vrot.lane.b32.xlu1 %v362_v25, %s1714_s7  ;;  %372 = vrot.lane.b32.xlu0 %v361_v26, %s1714_s7  ;;  %v746_v25 = vmul.f32 %v744_v16, %v1939_v4  ;;  %v749_v26 = vmul.f32 %v744_v16, %v1948_v10  ;;  %v474_v16 = vmul.f32 %v469_v11, %v1948_v10 }
  0x99   : > { %378 = vrot.lane.b32.xlu1 %v364_v27, %s1714_s7  ;;  %376 = vrot.lane.b32.xlu0 %v363_v28, %s1714_s7 }
  0x9d   : > { %407 = vrot.lane.b32.xlu1 %v396_v30, %s1715_s27  ;;  %405 = vrot.lane.b32.xlu0 %v395_v31, %s1715_s27 }
  0xa1   : > { %411 = vrot.lane.b32.xlu1 %v398_v32, %s1715_s27  ;;  %409 = vrot.lane.b32.xlu0 %v397_v33, %s1715_s27 }
  0xa5   : > { %440 = vrot.lane.b32.xlu1 %v430_v35, %s1716_s25  ;;  %413 = vrot.lane.b32.xlu0 %v399_v36, %s1715_s27 }
  0xa9   : > { %444 = vrot.lane.b32.xlu1 %v432_v37, %s1716_s25  ;;  %442 = vrot.lane.b32.xlu0 %v431_v38, %s1716_s25 }
  0xad   : > { %448 = vrot.lane.b32.xlu1 %v434_v39, %s1716_s25  ;;  %446 = vrot.lane.b32.xlu0 %v433_v40, %s1716_s25 }
  0xb1   : > { %495 = vrot.lane.b32.xlu1 %v484_v42, %s1711_s22  ;;  %493 = vrot.lane.b32.xlu0 %v483_v43, %s1711_s22 }
  0xb5   : > { %499 = vrot.lane.b32.xlu1 %v486_v44, %s1711_s22  ;;  %497 = vrot.lane.b32.xlu0 %v485_v45, %s1711_s22 }
  0xb9   : > { %529 = vrot.lane.b32.xlu1 %v519_v47, %s1712_s8  ;;  %501 = vrot.lane.b32.xlu0 %v487_v48, %s1711_s22 }
  0xbd   : > { %533 = vrot.lane.b32.xlu1 %v521_v49, %s1712_s8  ;;  %531 = vrot.lane.b32.xlu0 %v520_v50, %s1712_s8 }
  0xc1   : > { %537 = vrot.lane.b32.xlu1 %v523_v51, %s1712_s8  ;;  %535 = vrot.lane.b32.xlu0 %v522_v52, %s1712_s8 }
  0xc5   : > { %567 = vrot.lane.b32.xlu1 %v556_v54, %s1713_s30  ;;  %565 = vrot.lane.b32.xlu0 %v555_v55, %s1713_s30 }
  0xc9   : > { %571 = vrot.lane.b32.xlu1 %v558_v56, %s1713_s30  ;;  %569 = vrot.lane.b32.xlu0 %v557_v57, %s1713_s30 }
  0xcd   : > { %601 = vrot.lane.b32.xlu1 %v591_v59, %s1714_s7  ;;  %573 = vrot.lane.b32.xlu0 %v559_v60, %s1713_s30 }
  0xd1   : > { %605 = vrot.lane.b32.xlu1 %v593_v61, %s1714_s7  ;;  %603 = vrot.lane.b32.xlu0 %v592_v62, %s1714_s7 }
  0xd5   : > { %609 = vrot.lane.b32.xlu1 %v595_v63, %s1714_s7  ;;  %607 = vrot.lane.b32.xlu0 %v594_v2, %s1714_s7 }
  0xd9   : > { %639 = vrot.lane.b32.xlu1 %v628_v6, %s1715_s27  ;;  %637 = vrot.lane.b32.xlu0 %v627_v7, %s1715_s27 }
  0xdd   : > { %643 = vrot.lane.b32.xlu1 %v630_v8, %s1715_s27  ;;  %641 = vrot.lane.b32.xlu0 %v629_v9, %s1715_s27 }
  0xe1   : > { %645 = vrot.lane.b32.xlu0 %v631_v12, %s1715_s27  ;;  %721 = vrot.lane.b32.xlu1 %v710_v13, %s1711_s22  ;;  %v471_v12 = vmul.f32 %v469_v11, %v1939_v4 }
  0xe5   : > { %719 = vrot.lane.b32.xlu0 %v709_v14, %s1711_s22  ;;  %725 = vrot.lane.b32.xlu1 %v712_v15, %s1711_s22  ;;  %v475_v15 = vstv %s1446_s6  ;;  %s1470_s6 = sld [smem:[#allocation2 + $0x1b]] }
  0xe7   : > { %v2062_v19 = vpop.permute.xlu1 %269  ;;  %v2064_v20 = vpop.permute.xlu0 %265 }
  0xe9   : > { %723 = vrot.lane.b32.xlu0 %v711_v17, %s1711_s22  ;;  %755 = vrot.lane.b32.xlu1 %v745_v18, %s1712_s8  ;;  %v477_v17 = vadd.f32 %v475_v15, %v471_v12  ;;  %v473_v18 = vmul.f32 %v469_v11, %v1936_v3 }
  0xeb   : > { %v2070_v23 = vpop.permute.xlu1 %271  ;;  %v2072_v24 = vpop.permute.xlu0 %267 }
  0xed   : > { %727 = vrot.lane.b32.xlu0 %v713_v21, %s1711_s22  ;;  %759 = vrot.lane.b32.xlu1 %v747_v22, %s1712_s8  ;;  %v470_v21 = vmul.f32 %v469_v11, %v1933_v1 }
  0xef   : > { %v2078_v27 = vpop.permute.xlu1 %300  ;;  %v2080_v28 = vpop.permute.xlu0 %273 }
  0xf1   : > { %757 = vrot.lane.b32.xlu0 %v746_v25, %s1712_s8  ;;  %763 = vrot.lane.b32.xlu1 %v749_v26, %s1712_s8 }
  0xf3   : > { %v2085_v30 = vpop.permute.xlu1 %304  ;;  %v2087_v31 = vpop.permute.xlu0 %302 }
  0xf5   : > { %761 = vrot.lane.b32.xlu0 %v748_v29, %s1712_s8  ;;  %v480_v29 = vadd.f32 %v475_v15, %v474_v16 }
  0xf7   : > { %v2090_v32 = vpop.permute.xlu1 %308  ;;  %v2092_v33 = vpop.permute.xlu0 %306 }
  0xf8   : > { %2648 = vst [vmem:[#allocation14_spill] sm:$0xff] %v2090_v32 }
  0xfb   : > { %v2094_v34 = vpop.permute.xlu1 %337  ;;  %v2096_v35 = vpop.permute.xlu0 %335 }
  0xff   : > { %v2098_v36 = vpop.permute.xlu1 %341  ;;  %v2100_v37 = vpop.permute.xlu0 %339 }
 0x103   : > { %v2102_v38 = vpop.permute.xlu1 %370  ;;  %v2104_v39 = vpop.permute.xlu0 %343 }
 0x104   : > { %2649 = vst [vmem:[#allocation15_spill] sm:$0xff] %v2104_v39 }
 0x107   : > { %v2106_v40 = vpop.permute.xlu1 %374  ;;  %v2108_v41 = vpop.permute.xlu0 %372 }
 0x108   : > { %2650 = vst [vmem:[#allocation16_spill] sm:$0xff] %v2106_v40 }
 0x10b   : > { %v2110_v42 = vpop.permute.xlu1 %378  ;;  %v2112_v43 = vpop.permute.xlu0 %376 }
 0x10c   : > { %2651 = vst [vmem:[#allocation17_spill] sm:$0xff] %v2110_v42  ;;  %2652 = vst [vmem:[#allocation18_spill] sm:$0xff] %v2112_v43  ;;  %v472_v42 = vmul.f32 %v469_v11, %v1930_v0 }
 0x10e   : > { %v478_v40 = vadd.f32 %v475_v15, %v472_v42 }
 0x10f   : > { %v2114_v44 = vpop.permute.xlu1 %407  ;;  %v2116_v45 = vpop.permute.xlu0 %405 }
 0x110   : > { %2653 = vst [vmem:[#allocation19_spill] sm:$0xff] %v2116_v45 }
 0x113   : > { %v2118_v46 = vpop.permute.xlu1 %411  ;;  %v2120_v47 = vpop.permute.xlu0 %409 }
 0x114   : > { %2654 = vst [vmem:[#allocation20_spill] sm:$0xff] %v2118_v46  ;;  %2655 = vst [vmem:[#allocation21_spill] sm:$0xff] %v2120_v47 }
 0x117   : > { %v2122_v48 = vpop.permute.xlu1 %440  ;;  %v2124_v49 = vpop.permute.xlu0 %413 }
 0x118   : > { %2656 = vst [vmem:[#allocation22_spill] sm:$0xff] %v2122_v48  ;;  %2657 = vst [vmem:[#allocation23_spill] sm:$0xff] %v2124_v49 }
 0x11b   : > { %v2126_v50 = vpop.permute.xlu1 %444  ;;  %v2128_v51 = vpop.permute.xlu0 %442 }
 0x11c   : > { %2658 = vst [vmem:[#allocation24_spill] sm:$0xff] %v2126_v50  ;;  %2659 = vst [vmem:[#allocation25_spill] sm:$0xff] %v2128_v51  ;;  %v476_v50 = vadd.f32 %v475_v15, %v470_v21 }
 0x11f   : > { %v2130_v52 = vpop.permute.xlu1 %448  ;;  %v2132_v53 = vpop.permute.xlu0 %446 }
 0x120   : > { %2660 = vst [vmem:[#allocation26_spill] sm:$0xff] %v2130_v52  ;;  %2661 = vst [vmem:[#allocation27_spill] sm:$0xff] %v2132_v53  ;;  %v479_v53 = vadd.f32 %v475_v15, %v473_v18 }
 0x123   : > { %v496_v54 = vpop.permute.xlu1 %495  ;;  %v494_v55 = vpop.permute.xlu0 %493 }
 0x124   : > { %v503_v47 = vsel %vm275_vm0, %v494_v55, %v496_v54 }
 0x127   : > { %v500_v56 = vpop.permute.xlu1 %499  ;;  %v498_v57 = vpop.permute.xlu0 %497 }
 0x128   : > { %v504_v22 = vsel %vm275_vm0, %v496_v54, %v498_v57 }
 0x129   : > { %v513_v49 = vadd.f32 %v504_v22, %v477_v17  ;;  %v512_v22 = vadd.f32 %v503_v47, %v476_v50 }
 0x12b   : > { %v530_v58 = vpop.permute.xlu1 %529  ;;  %v502_v59 = vpop.permute.xlu0 %501 }
 0x12c   : > { %v506_v12 = vsel %vm275_vm0, %v500_v56, %v502_v59  ;;  %v516_v51 = vadd.f32 %v502_v59, %v480_v29 }
 0x12d   : > { %v515_v17 = vadd.f32 %v506_v12, %v479_v53 }
 0x12f   : > { %v534_v60 = vpop.permute.xlu1 %533  ;;  %v532_v61 = vpop.permute.xlu0 %531 }
 0x130   : > { %v540_v52 = vsel %vm310_vm1, %v532_v61, %v534_v60  ;;  %v539_v18 = vsel %vm310_vm1, %v530_v58, %v532_v61 }
 0x131   : > { %v549_v39 = vadd.f32 %v540_v52, %v513_v49  ;;  %v505_v49 = vsel %vm275_vm0, %v498_v57, %v500_v56  ;;  %v548_v29 = vadd.f32 %v539_v18, %v512_v22  ;;  %v898_v22 = vstv %s1461_s20  ;;  %s1460_s20 = sld [smem:[#allocation2 + $0x3]] }
 0x133   : > { %v538_v62 = vpop.permute.xlu1 %537  ;;  %v536_v63 = vpop.permute.xlu0 %535 }
 0x134   : > { %v542_v16 = vsel %vm310_vm1, %v536_v63, %v538_v62  ;;  %v552_v32 = vadd.f32 %v538_v62, %v516_v51  ;;  %v541_v42 = vsel %vm310_vm1, %v534_v60, %v536_v63  ;;  %v514_v51 = vadd.f32 %v505_v49, %v478_v40 }
 0x135   : > { %v551_v52 = vadd.f32 %v542_v16, %v515_v17 }
 0x137   : > { %v568_v2 = vpop.permute.xlu1 %567  ;;  %v566_v5 = vpop.permute.xlu0 %565 }
 0x138   : > { %v575_v54 = vsel %vm345_vm2, %v566_v5, %v568_v2 }
 0x139   : > { %v584_v61 = vadd.f32 %v575_v54, %v548_v29  ;;  %v899_v54 = vmul.f32 %v898_v22, %v1933_v1  ;;  %v901_v29 = vmul.f32 %v898_v22, %v1930_v0 }
 0x13b   : > { %v572_v6 = vpop.permute.xlu1 %571  ;;  %v570_v7 = vpop.permute.xlu0 %569 }
 0x13c   : > { %v576_v46 = vsel %vm345_vm2, %v568_v2, %v570_v7  ;;  %v577_v57 = vsel %vm345_vm2, %v570_v7, %v572_v6 }
 0x13d   : > { %v585_v11 = vadd.f32 %v576_v46, %v549_v39 }
 0x13f   : > { %v602_v8 = vpop.permute.xlu1 %601  ;;  %v574_v9 = vpop.permute.xlu0 %573 }
 0x140   : > { %v578_v45 = vsel %vm345_vm2, %v572_v6, %v574_v9  ;;  %v588_v53 = vadd.f32 %v574_v9, %v552_v32  ;;  %v550_v9 = vadd.f32 %v541_v42, %v514_v51 }
 0x141   : > { %v587_v46 = vadd.f32 %v578_v45, %v551_v52  ;;  %v900_v52 = vmul.f32 %v898_v22, %v1939_v4 }
 0x142   : > { %v586_v6 = vadd.f32 %v577_v57, %v550_v9  ;;  %v970_v57 = vstv %s1463_s29  ;;  %s1469_s29 = sld [smem:[#allocation2 + $0x5]] }
 0x143   : > { %v2135_v13 = vpop.permute.xlu1 %605  ;;  %v604_v14 = vpop.permute.xlu0 %603  ;;  %v975_v9 = vmul.f32 %v970_v57, %v1948_v10 }
 0x144   : > { %v612_v43 = vsel %vm380_vm3, %v604_v14, %v2135_v13  ;;  %v611_v47 = vsel %vm380_vm3, %v602_v8, %v604_v14 }
 0x145   : > { %v621_v55 = vadd.f32 %v612_v43, %v585_v11  ;;  %v620_v15 = vadd.f32 %v611_v47, %v584_v61  ;;  %v934_v47 = vstv %s1462_s4  ;;  %s1464_s4 = sld [smem:[#allocation2 + $0x20]] }
 0x146   : > { %v936_v51 = vmul.f32 %v934_v47, %v1939_v4  ;;  %v935_v61 = vmul.f32 %v934_v47, %v1933_v1 }
 0x147   : > { %v610_v25 = vpop.permute.xlu1 %609  ;;  %v608_v26 = vpop.permute.xlu0 %607 }
 0x148   : > { %v614_v58 = vsel %vm380_vm3, %v608_v26, %v610_v25  ;;  %v624_v56 = vadd.f32 %v610_v25, %v588_v53  ;;  %v613_v40 = vsel %vm380_vm3, %v2135_v13, %v608_v26 }
 0x149   : > { %v623_v43 = vadd.f32 %v614_v58, %v587_v46  ;;  %v622_v12 = vadd.f32 %v613_v40, %v586_v6  ;;  %v903_v58 = vmul.f32 %v898_v22, %v1948_v10  ;;  %v1088_v6 = vstv %s1467_s9  ;;  %s1484_s9 = sshll.u32 %s1760_s16, 9  ;;  %s1718_s16 = smov [#allocation9]  }
 0x14b   : > { %v638_v48 = vpop.permute.xlu0 %637  ;;  %v640_v21 = vpop.permute.xlu1 %639 }
 0x14c   : > { %v647_v62 = vsel %vm415_vm4, %v638_v48, %v640_v21  ;;  %v780_v48 = vstv %s2151_s17  ;;  %s1453_s17 = sld [smem:[#allocation2 + $0x1e]] }
 0x14d   : > { %v656_v7 = vadd.f32 %v647_v62, %v620_v15  ;;  %v781_v16 = vmul.f32 %v780_v48, %v1933_v1  ;;  %v783_v17 = vmul.f32 %v780_v48, %v1930_v0  ;;  %v782_v11 = vmul.f32 %v780_v48, %v1939_v4 }
 0x14e   : > { %v784_v49 = vmul.f32 %v780_v48, %v1936_v3  ;;  %v971_v62 = vmul.f32 %v970_v57, %v1933_v1  ;;  %v1052_v15 = vstv %s1466_s26  ;;  %s235_s26 = scalar_lea.vmem [#allocation9], %s1436_s11 }
 0x14f   : > { %v642_v59 = vpop.permute.xlu0 %641  ;;  %v644_v32 = vpop.permute.xlu1 %643  ;;  %v661_v26 = vmul.f32 %v656_v7, %v1933_v1  ;;  %v1053_v40 = vmul.f32 %v1052_v15, %v1933_v1  ;;  %v1055_v7 = vmul.f32 %v1052_v15, %v1930_v0 }
 0x150   : > { %v648_v39 = vsel %vm415_vm4, %v640_v21, %v642_v59  ;;  %v649_v14 = vsel %vm415_vm4, %v642_v59, %v644_v32  ;;  %v785_v21 = vmul.f32 %v780_v48, %v1948_v10  ;;  %v816_v59 = vstv %s1458_s5  ;;  %s1459_s5 = sld [smem:[#allocation2 + $0x1f]] }
 0x151   : > { %v657_v50 = vadd.f32 %v648_v39, %v621_v55  ;;  %v658_v13 = vadd.f32 %v649_v14, %v622_v12  ;;  %v902_v55 = vmul.f32 %v898_v22, %v1936_v3  ;;  %v817_v53 = vmul.f32 %v816_v59, %v1933_v1 }
 0x152   : > { %v819_v39 = vmul.f32 %v816_v59, %v1930_v0  ;;  %v818_v42 = vmul.f32 %v816_v59, %v1939_v4  ;;  %v821_v46 = vmul.f32 %v816_v59, %v1948_v10  ;;  %v1057_v48 = vmul.f32 %v1052_v15, %v1948_v10 }
 0x153   : > { %v646_v2 = vpop.permute.xlu0 %645  ;;  %v662_v5 = vmul.f32 %v657_v50, %v1939_v4  ;;  %v663_v18 = vmul.f32 %v658_v13, %v1930_v0  ;;  %v820_v50 = vmul.f32 %v816_v59, %v1936_v3  ;;  %v1091_v14 = vmul.f32 %v1088_v6, %v1930_v0 }
 0x154   : > { %v650_v45 = vsel %vm415_vm4, %v644_v32, %v646_v2  ;;  %v660_v60 = vadd.f32 %v646_v2, %v624_v56  ;;  %v938_v56 = vmul.f32 %v934_v47, %v1936_v3  ;;  %v939_v32 = vmul.f32 %v934_v47, %v1948_v10 }
 0x155   : > { %v659_v63 = vadd.f32 %v650_v45, %v623_v43  ;;  %673 = vrot.lane.b32.xlu0 %v662_v5, %s1711_s22  ;;  %v937_v43 = vmul.f32 %v934_v47, %v1930_v0  ;;  %v973_v2 = vmul.f32 %v970_v57, %v1930_v0  ;;  %v972_v5 = vmul.f32 %v970_v57, %v1939_v4 }
 0x156   : > { %v665_v8 = vmul.f32 %v660_v60, %v1948_v10  ;;  %v974_v45 = vmul.f32 %v970_v57, %v1936_v3  ;;  %v1054_v60 = vmul.f32 %v1052_v15, %v1939_v4  ;;  %v1093_v12 = vmul.f32 %v1088_v6, %v1948_v10 }
 0x157   : > { %v664_v25 = vmul.f32 %v659_v63, %v1936_v3  ;;  %v1056_v63 = vmul.f32 %v1052_v15, %v1936_v3  ;;  %v1092_v13 = vmul.f32 %v1088_v6, %v1936_v3 }
 0x158   : > { %679 = vrot.lane.b32.xlu1 %v665_v8, %s1711_s22  ;;  %v1089_v8 = vmul.f32 %v1088_v6, %v1933_v1 }
 0x159   : > { %677 = vrot.lane.b32.xlu0 %v664_v25, %s1711_s22  ;;  %v1090_v25 = vmul.f32 %v1088_v6, %v1939_v4 }
 0x15c   : > { %671 = vrot.lane.b32.xlu1 %v661_v26, %s1711_s22 }
 0x15d   : > { %791 = vrot.lane.b32.xlu0 %v781_v16, %s1713_s30  ;;  %v1170_v16 = vstv %s1470_s6  ;;  %s1320_s6 = sshll.u32 %s235_s26, 4  ;;  %s2580_s6 = int_to_ptr.vmem [resolvable:$true] %s1320_s6 }
 0x15e   : > { %v1172_v26 = vmul.f32 %v1170_v16, %v1939_v4  ;;  %v1175_v22 = vmul.f32 %v1170_v16, %v1948_v10 }
 0x160   : > { %675 = vrot.lane.b32.xlu1 %v663_v18, %s1711_s22  ;;  %v1174_v18 = vmul.f32 %v1170_v16, %v1936_v3 }
 0x161   : > { %795 = vrot.lane.b32.xlu0 %v783_v17, %s1713_s30  ;;  %v1171_v17 = vmul.f32 %v1170_v16, %v1933_v1 }
 0x164   : > { %793 = vrot.lane.b32.xlu1 %v782_v11, %s1713_s30  ;;  %v1173_v11 = vmul.f32 %v1170_v16, %v1930_v0 }
 0x165   : > { %799 = vrot.lane.b32.xlu0 %v785_v21, %s1713_s30  ;;  %v720_v21 = vpop.permute.xlu0 %719 }
 0x168   : > { %797 = vrot.lane.b32.xlu1 %v784_v49, %s1713_s30  ;;  %v722_v49 = vpop.permute.xlu1 %721 }
 0x169   : > { %911 = vrot.lane.b32.xlu0 %v900_v52, %s1711_s22  ;;  %v724_v52 = vpop.permute.xlu0 %723  ;;  %v729_v16 = vsel %vm275_vm0, %v720_v21, %v722_v49 }
 0x16c   : > { %909 = vrot.lane.b32.xlu1 %v899_v54, %s1711_s22  ;;  %v726_v54 = vpop.permute.xlu1 %725 }
 0x16d   : > { %915 = vrot.lane.b32.xlu0 %v902_v55, %s1711_s22  ;;  %v728_v55 = vpop.permute.xlu0 %727 }
 0x170   : > { %913 = vrot.lane.b32.xlu1 %v901_v29, %s1711_s22  ;;  %v756_v59 = vpop.permute.xlu1 %755 }
 0x171   : > { %827 = vrot.lane.b32.xlu0 %v817_v53, %s1714_s7  ;;  %v758_v29 = vpop.permute.xlu0 %757 }
 0x174   : > { %917 = vrot.lane.b32.xlu1 %v903_v58, %s1711_s22  ;;  %v760_v53 = vpop.permute.xlu1 %759 }
 0x175   : > { %831 = vrot.lane.b32.xlu0 %v819_v39, %s1714_s7  ;;  %v762_v58 = vpop.permute.xlu0 %761 }
 0x178   : > { %829 = vrot.lane.b32.xlu1 %v818_v42, %s1714_s7  ;;  %v2256_v39 = vpop.permute.xlu1 %763 }
 0x179   : > { %835 = vrot.lane.b32.xlu0 %v821_v46, %s1714_s7 }
 0x17c   : > { %833 = vrot.lane.b32.xlu1 %v820_v50, %s1714_s7 }
 0x17d   : > { %947 = vrot.lane.b32.xlu0 %v936_v51, %s1712_s8 }
 0x180   : > { %945 = vrot.lane.b32.xlu1 %v935_v61, %s1712_s8 }
 0x181   : > { %951 = vrot.lane.b32.xlu0 %v938_v56, %s1712_s8 }
 0x184   : > { %949 = vrot.lane.b32.xlu1 %v937_v43, %s1712_s8 }
 0x185   : > { %981 = vrot.lane.b32.xlu0 %v971_v62, %s1713_s30 }
 0x188   : > { %953 = vrot.lane.b32.xlu1 %v939_v32, %s1712_s8 }
 0x189   : > { %985 = vrot.lane.b32.xlu0 %v973_v2, %s1713_s30 }
 0x18c   : > { %983 = vrot.lane.b32.xlu1 %v972_v5, %s1713_s30 }
 0x18d   : > { %989 = vrot.lane.b32.xlu0 %v975_v9, %s1713_s30 }
 0x190   : > { %987 = vrot.lane.b32.xlu1 %v974_v45, %s1713_s30 }
 0x191   : > { %1065 = vrot.lane.b32.xlu0 %v1054_v60, %s1711_s22 }
 0x194   : > { %1063 = vrot.lane.b32.xlu1 %v1053_v40, %s1711_s22 }
 0x195   : > { %1069 = vrot.lane.b32.xlu0 %v1056_v63, %s1711_s22  ;;  %v701_v63 = vstv %s1453_s17  ;;  %s2578_s17 = scalar_lea.hbm %s2625_s3, %s1484_s9 }
 0x198   : > { %1067 = vrot.lane.b32.xlu1 %v1055_v7, %s1711_s22 }
 0x199   : > { %1099 = vrot.lane.b32.xlu0 %v1089_v8, %s1712_s8 }
 0x19c   : > { %1071 = vrot.lane.b32.xlu1 %v1057_v48, %s1711_s22 }
 0x19d   : > { %1103 = vrot.lane.b32.xlu0 %v1091_v14, %s1712_s8 }
 0x1a0   : > { %1101 = vrot.lane.b32.xlu1 %v1090_v25, %s1712_s8 }
 0x1a1   : > { %1107 = vrot.lane.b32.xlu0 %v1093_v12, %s1712_s8 }
 0x1a4   : > { %1105 = vrot.lane.b32.xlu1 %v1092_v13, %s1712_s8  ;;  %v730_v13 = vsel %vm275_vm0, %v722_v49, %v724_v52 }
 0x1a5   : > { %1183 = vrot.lane.b32.xlu0 %v1172_v26, %s1711_s22 }
 0x1a8   : > { %1181 = vrot.lane.b32.xlu1 %v1171_v17, %s1711_s22 }
 0x1a9   : > { %1187 = vrot.lane.b32.xlu0 %v1174_v18, %s1711_s22 }
 0x1ac   : > { %1185 = vrot.lane.b32.xlu1 %v1173_v11, %s1711_s22 }
 0x1b0   : > { %1189 = vrot.lane.b32.xlu1 %v1175_v22, %s1711_s22  ;;  %s1454_s22 = sld [smem:[#allocation2 + $0x2]] }
 0x1b6   : > { %v695_v9 = vstv %s1454_s22 }
 0x1b7   : > { %v696_v60 = vmul.f32 %v695_v9, %v1933_v1  ;;  %v697_v40 = vmul.f32 %v695_v9, %v1939_v4  ;;  %v698_v7 = vmul.f32 %v695_v9, %v1930_v0  ;;  %v699_v25 = vmul.f32 %v695_v9, %v1936_v3 }
 0x1b8   : > { %v700_v12 = vmul.f32 %v695_v9, %v1948_v10  ;;  %v766_v9 = vsel %vm310_vm1, %v758_v29, %v760_v53 }
 0x1b9   : > { %v702_v48 = vadd.f32 %v701_v63, %v696_v60  ;;  %v703_v14 = vadd.f32 %v701_v63, %v697_v40  ;;  %v704_v17 = vadd.f32 %v701_v63, %v698_v7 }
 0x1bb   : > { %v738_v11 = vadd.f32 %v729_v16, %v702_v48  ;;  %v739_v22 = vadd.f32 %v730_v13, %v703_v14 }
 0x1c7   : > { %v674_v42 = vpop.permute.xlu0 %673 }
 0x1ca   : > { %v680_v46 = vpop.permute.xlu1 %679 }
 0x1cb   : > { %v678_v47 = vpop.permute.xlu0 %677 }
 0x1cc   : > { %v2259_v50 = vsel %vm275_vm0, %v678_v47, %v680_v46  ;;  %v706_v46 = vadd.f32 %v701_v63, %v700_v12 }
 0x1ce   : > { %v672_v51 = vpop.permute.xlu1 %671 }
 0x1cf   : > { %v2262_v61 = vsel %vm275_vm0, %v672_v51, %v674_v42  ;;  %v792_v56 = vpop.permute.xlu0 %791  ;;  %v732_v51 = vsel %vm275_vm0, %v726_v54, %v728_v55 }
 0x1d2   : > { %v676_v57 = vpop.permute.xlu1 %675 }
 0x1d3   : > { %v2265_v43 = vsel %vm275_vm0, %v674_v42, %v676_v57  ;;  %v2268_v62 = vsel %vm275_vm0, %v676_v57, %v678_v47  ;;  %v796_v32 = vpop.permute.xlu0 %795  ;;  %v705_v42 = vadd.f32 %v701_v63, %v699_v25  ;;  %v731_v47 = vsel %vm275_vm0, %v724_v52, %v726_v54 }
 0x1d4   : > { %v765_v57 = vsel %vm310_vm1, %v756_v59, %v758_v29  ;;  %v740_v7 = vadd.f32 %v731_v47, %v704_v17  ;;  %v775_v25 = vadd.f32 %v766_v9, %v739_v22  ;;  %v742_v63 = vadd.f32 %v728_v55, %v706_v46 }
 0x1d5   : > { %v741_v48 = vadd.f32 %v732_v51, %v705_v42  ;;  %v774_v14 = vadd.f32 %v765_v57, %v738_v11  ;;  %v767_v52 = vsel %vm310_vm1, %v760_v53, %v762_v58  ;;  %v768_v54 = vsel %vm310_vm1, %v762_v58, %v2256_v39 }
 0x1d6   : > { %v794_v2 = vpop.permute.xlu1 %793  ;;  %v776_v11 = vadd.f32 %v767_v52, %v740_v7  ;;  %v778_v42 = vadd.f32 %v2256_v39, %v742_v63  ;;  %v885_v39 = vstv %s1460_s20  ;;  %s1306_s20 = scalar_lea.sflag [#allocation4], %s1909_s28 }
 0x1d7   : > { %v800_v5 = vpop.permute.xlu0 %799  ;;  %v801_v21 = vsel %vm345_vm2, %v792_v56, %v794_v2  ;;  %v802_v49 = vsel %vm345_vm2, %v794_v2, %v796_v32  ;;  %v777_v55 = vadd.f32 %v768_v54, %v741_v48  ;;  %v887_v52 = vmul.f32 %v885_v39, %v1939_v4 }
 0x1d8   : > { %v810_v59 = vadd.f32 %v801_v21, %v774_v14  ;;  %v811_v29 = vadd.f32 %v802_v49, %v775_v25  ;;  %v814_v9 = vadd.f32 %v800_v5, %v778_v42 }
 0x1da   : > { %v798_v15 = vpop.permute.xlu1 %797 }
 0x1db   : > { %v2270_v45 = vpop.permute.xlu0 %911  ;;  %v803_v16 = vsel %vm345_vm2, %v796_v32, %v798_v15  ;;  %v804_v56 = vsel %vm345_vm2, %v798_v15, %v800_v5  ;;  %v891_v5 = vstv %s1459_s5  ;;  %s1632_s5 = scalar_lea.vmem %s2580_s6, 512 }
 0x1dc   : > { %v812_v58 = vadd.f32 %v803_v16, %v776_v11  ;;  %v813_v46 = vadd.f32 %v804_v56, %v777_v55  ;;  %v888_v16 = vmul.f32 %v885_v39, %v1930_v0  ;;  %v893_v56 = vadd.f32 %v891_v5, %v887_v52  ;;  %p1633_p0 = scmp.ne.s32.totalorder %s2580_s6, %s1632_s5 }
 0x1de   : > { %v2274_v6 = vpop.permute.xlu1 %909  ;;  %p1634_p7 = pnand %p1633_p0, %p2676_p8 }
 0x1df   : > { %v2277_v8 = vpop.permute.xlu0 %915 }
 0x1e0   : > { %p1635_p3 = pneg %p1634_p7 }
 0x1e2   : > { %v2283_v26 = vpop.permute.xlu1 %913 }
 0x1e3   : > { %v828_v18 = vpop.permute.xlu0 %827 }
 0x1e6   : > { %v2289_v60 = vpop.permute.xlu1 %917 }
 0x1e7   : > { %v832_v40 = vpop.permute.xlu0 %831 }
 0x1ea   : > { %v830_v12 = vpop.permute.xlu1 %829 }
 0x1eb   : > { %v837_v2 = vsel %vm380_vm3, %v828_v18, %v830_v12  ;;  %v838_v13 = vsel %vm380_vm3, %v830_v12, %v832_v40  ;;  %v836_v17 = vpop.permute.xlu0 %835 }
 0x1ec   : > { %v846_v22 = vadd.f32 %v837_v2, %v810_v59  ;;  %v847_v53 = vadd.f32 %v838_v13, %v811_v29  ;;  %v850_v7 = vadd.f32 %v836_v17, %v814_v9  ;;  %v889_v2 = vmul.f32 %v885_v39, %v1936_v3 }
 0x1ed   : > { %v890_v13 = vmul.f32 %v885_v39, %v1948_v10 }
 0x1ee   : > { %v851_v47 = vmul.f32 %v846_v22, %v1933_v1  ;;  %v852_v32 = vmul.f32 %v847_v53, %v1939_v4  ;;  %v834_v51 = vpop.permute.xlu1 %833  ;;  %v855_v54 = vmul.f32 %v850_v7, %v1948_v10  ;;  %v920_v4 = vsel %vm275_vm0, %v2270_v45, %v2283_v26 }
 0x1ef   : > { %v839_v15 = vsel %vm380_vm3, %v832_v40, %v834_v51  ;;  %v840_v18 = vsel %vm380_vm3, %v834_v51, %v836_v17  ;;  %v948_v57 = vpop.permute.xlu0 %947  ;;  %v886_v40 = vmul.f32 %v885_v39, %v1933_v1  ;;  %v919_v1 = vsel %vm275_vm0, %v2274_v6, %v2270_v45 }
 0x1f0   : > { %v848_v21 = vadd.f32 %v839_v15, %v812_v58  ;;  %v849_v49 = vadd.f32 %v840_v18, %v813_v46  ;;  %861 = vrot.lane.b32.xlu0 %v851_v47, %s1712_s8  ;;  %863 = vrot.lane.b32.xlu1 %v852_v32, %s1712_s8  ;;  %v929_v53 = vadd.f32 %v920_v4, %v893_v56 }
 0x1f1   : > { %v892_v12 = vadd.f32 %v891_v5, %v886_v40  ;;  %v895_v42 = vadd.f32 %v891_v5, %v889_v2  ;;  %v921_v6 = vsel %vm275_vm0, %v2283_v26, %v2277_v8  ;;  %v896_v58 = vadd.f32 %v891_v5, %v890_v13  ;;  %v2354_v2 = vld [vmem:[%s1915_s10 + $0x18] sm:$0xff] }
 0x1f2   : > { %v853_v48 = vmul.f32 %v848_v21, %v1930_v0  ;;  %v854_v14 = vmul.f32 %v849_v49, %v1936_v3  ;;  %v946_v25 = vpop.permute.xlu1 %945  ;;  %v894_v3 = vadd.f32 %v891_v5, %v888_v16  ;;  %v922_v45 = vsel %vm275_vm0, %v2277_v8, %v2289_v60  ;;  %v2350_v16 = vld [vmem:[%s1915_s10 + $0x10] sm:$0xff] }
 0x1f3   : > { %v952_v63 = vpop.permute.xlu0 %951  ;;  %v955_v11 = vsel %vm310_vm1, %v946_v25, %v948_v57  ;;  %v928_v22 = vadd.f32 %v919_v1, %v892_v12  ;;  %v931_v9 = vadd.f32 %v922_v45, %v895_v42  ;;  %v932_v8 = vadd.f32 %v2289_v60, %v896_v58  ;;  %v2342_v25 = vld [vmem:[%s1915_s10 + $0x8] sm:$0xff] }
 0x1f4   : > { %865 = vrot.lane.b32.xlu0 %v853_v48, %s1712_s8  ;;  %867 = vrot.lane.b32.xlu1 %v854_v14, %s1712_s8  ;;  %v930_v26 = vadd.f32 %v921_v6, %v894_v3  ;;  %v2338_v48 = vld [vmem:[%s1915_s10] sm:$0xff]  ;;  %s1468_s10 = sld [smem:[#allocation2 + $0x21]] }
 0x1f5   : > { %v964_v10 = vadd.f32 %v955_v11, %v928_v22  ;;  %v2360_v11 = vld [vmem:[%s1923_s19] sm:$0xff]  ;;  %s2376_s19 = sld [smem:[#allocation2 + $0x6]] }
 0x1f6   : > { %v950_v59 = vpop.permute.xlu1 %949 }
 0x1f7   : > { %v982_v29 = vpop.permute.xlu0 %981  ;;  %v956_v0 = vsel %vm310_vm1, %v948_v57, %v950_v59  ;;  %v957_v32 = vsel %vm310_vm1, %v950_v59, %v952_v63 }
 0x1f8   : > { %869 = vrot.lane.b32.xlu0 %v855_v54, %s1712_s8  ;;  %v965_v46 = vadd.f32 %v956_v0, %v929_v53  ;;  %s1465_s8 = sld [smem:[#allocation2 + $0x4]]  ;;  %v966_v39 = vadd.f32 %v957_v32, %v930_v26  ;;  %v1045_v53 = vstv %s1464_s4 }
 0x1fa   : > { %v954_v17 = vpop.permute.xlu1 %953 }
 0x1fb   : > { %v986_v55 = vpop.permute.xlu0 %985  ;;  %v958_v51 = vsel %vm310_vm1, %v952_v63, %v954_v17  ;;  %v968_v60 = vadd.f32 %v954_v17, %v932_v8 }
 0x1fc   : > { %v967_v7 = vadd.f32 %v958_v51, %v931_v9 }
 0x1fe   : > { %v984_v47 = vpop.permute.xlu1 %983  ;;  %v1039_v13 = vstv %s1465_s8  ;;  %s1636_s8 = sshll.u32 %s1718_s16, 4  ;;  %s1637_s8 = int_to_ptr.vmem [resolvable:$false] %s1636_s8 }
 0x1ff   : > { %v991_v15 = vsel %vm345_vm2, %v982_v29, %v984_v47  ;;  %v992_v18 = vsel %vm345_vm2, %v984_v47, %v986_v55  ;;  %v990_v57 = vpop.permute.xlu0 %989  ;;  %v1041_v22 = vmul.f32 %v2342_v25, %v1039_v13  ;;  %v1042_v6 = vmul.f32 %v2350_v16, %v1039_v13  ;;  %s1638_s4 = scalar_lea.vmem %s1637_s8, 1024  ;;  %p1639_p1 = scmp.lt.s32.totalorder %s2580_s6, %s1637_s8 }
 0x200   : > { %v1000_v21 = vadd.f32 %v991_v15, %v964_v10  ;;  %v1001_v49 = vadd.f32 %v992_v18, %v965_v46  ;;  %v1004_v12 = vadd.f32 %v990_v57, %v968_v60  ;;  %v1043_v10 = vmul.f32 %v2354_v2, %v1039_v13  ;;  %p1640_p4 = scmp.lt.s32.totalorder %s1638_s4, %s1632_s5 }
 0x201   : > { %v1047_v45 = vadd.f32 %v1045_v53, %v1041_v22  ;;  %v1157_v47 = vstv %s1469_s29  ;;  %v1044_v18 = vmul.f32 %v2360_v11, %v1039_v13 }
 0x202   : > { %v1005_v14 = vmul.f32 %v2338_v48, %v1000_v21  ;;  %v1006_v63 = vmul.f32 %v2342_v25, %v1001_v49  ;;  %v988_v40 = vpop.permute.xlu1 %987  ;;  %v1009_v0 = vmul.f32 %v2360_v11, %v1004_v12  ;;  %v1158_v26 = vmul.f32 %v2338_v48, %v1157_v47  ;;  %p1641_p5 = por %p1640_p4, %p1639_p1 }
 0x203   : > { %v993_v52 = vsel %vm345_vm2, %v986_v55, %v988_v40  ;;  %v994_v5 = vsel %vm345_vm2, %v988_v40, %v990_v57  ;;  %v1066_v54 = vpop.permute.xlu0 %1065  ;;  %v1040_v55 = vmul.f32 %v2338_v48, %v1039_v13  ;;  %v1048_v57 = vadd.f32 %v1045_v53, %v1042_v6 }
 0x204   : > { %v1002_v59 = vadd.f32 %v993_v52, %v966_v39  ;;  %v1003_v29 = vadd.f32 %v994_v5, %v967_v7  ;;  %1015 = vrot.lane.b32.xlu1 %v1005_v14, %s1713_s30  ;;  %1017 = vrot.lane.b32.xlu0 %v1006_v63, %s1713_s30  ;;  %v1049_v49 = vadd.f32 %v1045_v53, %v1043_v10  ;;  %v1163_v39 = vstv %s1468_s10  ;;  %p1642_p6 = pnand %p1641_p5, %p1635_p3 }
 0x205   : > { %v1046_v58 = vadd.f32 %v1045_v53, %v1040_v55  ;;  %v1050_v5 = vadd.f32 %v1045_v53, %v1044_v18  ;;  %v1159_v55 = vmul.f32 %v2342_v25, %v1157_v47  ;;  %v1160_v22 = vmul.f32 %v2350_v16, %v1157_v47 }
 0x206   : > { %v1007_v56 = vmul.f32 %v2350_v16, %v1002_v59  ;;  %v1008_v1 = vmul.f32 %v2354_v2, %v1003_v29  ;;  %v1064_v4 = vpop.permute.xlu1 %1063  ;;  %v1164_v59 = vadd.f32 %v1163_v39, %v1158_v26  ;;  %v1161_v26 = vmul.f32 %v2354_v2, %v1157_v47 }
 0x207   : > { %v1070_v17 = vpop.permute.xlu0 %1069  ;;  %v1073_v32 = vsel %vm275_vm0, %v1064_v4, %v1066_v54  ;;  %v1166_v18 = vadd.f32 %v1163_v39, %v1160_v22 }
 0x208   : > { %1019 = vrot.lane.b32.xlu1 %v1007_v56, %s1713_s30  ;;  %1021 = vrot.lane.b32.xlu0 %v1008_v1, %s1713_s30  ;;  %v1082_v9 = vadd.f32 %v1073_v32, %v1046_v58  ;;  %v1162_v32 = vmul.f32 %v2360_v11, %v1157_v47  ;;  %v1167_v47 = vadd.f32 %v1163_v39, %v1161_v26 }
 0x20a   : > { %v1068_v3 = vpop.permute.xlu1 %1067 }
 0x20b   : > { %v1100_v42 = vpop.permute.xlu0 %1099  ;;  %v1074_v51 = vsel %vm275_vm0, %v1066_v54, %v1068_v3  ;;  %v1075_v7 = vsel %vm275_vm0, %v1068_v3, %v1070_v17 }
 0x20c   : > { %1023 = vrot.lane.b32.xlu1 %v1009_v0, %s1713_s30  ;;  %v1083_v21 = vadd.f32 %v1074_v51, %v1047_v45  ;;  %v1084_v29 = vadd.f32 %v1075_v7, %v1048_v57  ;;  %s1471_s30 = sld [smem:[#allocation2 + $0x22]]  ;;  %v1168_v7 = vadd.f32 %v1163_v39, %v1162_v32 }
 0x20e   : > { %v1072_v46 = vpop.permute.xlu1 %1071 }
 0x20f   : > { %v1104_v15 = vpop.permute.xlu0 %1103  ;;  %v1076_v14 = vsel %vm275_vm0, %v1070_v17, %v1072_v46  ;;  %v1086_v3 = vadd.f32 %v1072_v46, %v1050_v5 }
 0x210   : > { %v1085_v12 = vadd.f32 %v1076_v14, %v1049_v49 }
 0x212   : > { %v1102_v8 = vpop.permute.xlu1 %1101 }
 0x213   : > { %v1109_v63 = vsel %vm310_vm1, %v1100_v42, %v1102_v8  ;;  %v1110_v40 = vsel %vm310_vm1, %v1102_v8, %v1104_v15  ;;  %v1108_v52 = vpop.permute.xlu0 %1107 }
 0x214   : > { %v1118_v54 = vadd.f32 %v1109_v63, %v1082_v9  ;;  %v1119_v60 = vadd.f32 %v1110_v40, %v1083_v21  ;;  %v1122_v6 = vadd.f32 %v1108_v52, %v1086_v3  ;;  %v1239_v9 = vstv %s2376_s19 }
 0x215   : > { %v1240_v40 = vmul.f32 %v2338_v48, %v1239_v9 }
 0x216   : > { %v1123_v56 = vmul.f32 %v2338_v48, %v1118_v54  ;;  %v1124_v1 = vmul.f32 %v2342_v25, %v1119_v60  ;;  %v1106_v4 = vpop.permute.xlu1 %1105  ;;  %v1127_v21 = vmul.f32 %v2360_v11, %v1122_v6  ;;  %v1245_v60 = vstv %s1471_s30 }
 0x217   : > { %v1111_v13 = vsel %vm310_vm1, %v1104_v15, %v1106_v4  ;;  %v1112_v17 = vsel %vm310_vm1, %v1106_v4, %v1108_v52  ;;  %v1184_v0 = vpop.permute.xlu0 %1183  ;;  %v1165_v15 = vadd.f32 %v1163_v39, %v1159_v55  ;;  %v1241_v52 = vmul.f32 %v2342_v25, %v1239_v9 }
 0x218   : > { %v1120_v53 = vadd.f32 %v1111_v13, %v1084_v29  ;;  %v1121_v42 = vadd.f32 %v1112_v17, %v1085_v12  ;;  %1133 = vrot.lane.b32.xlu0 %v1123_v56, %s1714_s7  ;;  %1135 = vrot.lane.b32.xlu1 %v1124_v1, %s1714_s7  ;;  %v1246_v4 = vadd.f32 %v1245_v60, %v1240_v40 }
 0x219   : > { %v1247_v13 = vadd.f32 %v1245_v60, %v1241_v52  ;;  %v1243_v39 = vmul.f32 %v2354_v2, %v1239_v9  ;;  %v276_v52 = vsel %vm275_vm0, %v2064_v20, %v2072_v24  ;;  %v277_v20 = vsel %vm275_vm0, %v2072_v24, %v2062_v19 }
 0x21a   : > { %v1125_v58 = vmul.f32 %v2350_v16, %v1120_v53  ;;  %v1126_v45 = vmul.f32 %v2354_v2, %v1121_v42  ;;  %v1182_v10 = vpop.permute.xlu1 %1181  ;;  %v1251_v3 = vmul.f32 %v2338_v48, %v1246_v4 }
 0x21b   : > { %v1191_v51 = vsel %vm275_vm0, %v1182_v10, %v1184_v0  ;;  %v1188_v57 = vpop.permute.xlu0 %1187  ;;  %v1252_v53 = vmul.f32 %v2342_v25, %v1247_v13  ;;  %v1249_v6 = vadd.f32 %v1245_v60, %v1243_v39  ;;  %v312_v13 = vsel %vm310_vm1, %v2087_v31, %v2085_v30 }
 0x21c   : > { %v1200_v46 = vadd.f32 %v1191_v51, %v1164_v59  ;;  %1137 = vrot.lane.b32.xlu0 %v1125_v58, %s1714_s7  ;;  %1139 = vrot.lane.b32.xlu1 %v1126_v45, %s1714_s7  ;;  %v1244_v58 = vmul.f32 %v2360_v11, %v1239_v9 }
 0x21d   : > { %v1254_v10 = vmul.f32 %v2354_v2, %v1249_v6 }
 0x21e   : > { %v1205_v49 = vmul.f32 %v2338_v48, %v1200_v46  ;;  %v1186_v8 = vpop.permute.xlu1 %1185  ;;  %v1250_v32 = vadd.f32 %v1245_v60, %v1244_v58 }
 0x21f   : > { %v1192_v14 = vsel %vm275_vm0, %v1184_v0, %v1186_v8  ;;  %v1193_v63 = vsel %vm275_vm0, %v1186_v8, %v1188_v57  ;;  %v1242_v0 = vmul.f32 %v2350_v16, %v1239_v9 }
 0x220   : > { %v1201_v5 = vadd.f32 %v1192_v14, %v1165_v15  ;;  %v1202_v54 = vadd.f32 %v1193_v63, %v1166_v18  ;;  %1141 = vrot.lane.b32.xlu0 %v1127_v21, %s1714_s7  ;;  %1215 = vrot.lane.b32.xlu1 %v1205_v49, %s1715_s27  ;;  %v1255_v51 = vmul.f32 %v2360_v11, %v1250_v32  ;;  %s242_s7 = sld [smem:[#allocation2]]  ;;  %v2666_v32 = vld [vmem:[#allocation25_spill] sm:$0xff] }
 0x221   : > { %v1248_v42 = vadd.f32 %v1245_v60, %v1242_v0  ;;  %v381_v0 = vsel %vm380_vm3, %v2102_v38, %v2108_v41  ;;  %v2662_v38 = vld [vmem:[#allocation19_spill] sm:$0xff] }
 0x222   : > { %v1206_v59 = vmul.f32 %v2342_v25, %v1201_v5  ;;  %v1207_v29 = vmul.f32 %v2350_v16, %v1202_v54  ;;  %v1190_v12 = vpop.permute.xlu1 %1189  ;;  %v311_v54 = vsel %vm310_vm1, %v2078_v27, %v2087_v31  ;;  %v347_v31 = vsel %vm345_vm2, %v2094_v34, %v2100_v37 }
 0x223   : > { %v1194_v56 = vsel %vm275_vm0, %v1188_v57, %v1190_v12  ;;  %v1204_v1 = vadd.f32 %v1190_v12, %v1168_v7  ;;  %v1253_v45 = vmul.f32 %v2350_v16, %v1248_v42  ;;  %v2663_v42 = vld [vmem:[#allocation14_spill] sm:$0xff] }
 0x224   : > { %v1203_v17 = vadd.f32 %v1194_v56, %v1167_v47  ;;  %1217 = vrot.lane.b32.xlu0 %v1206_v59, %s1715_s27  ;;  %1219 = vrot.lane.b32.xlu1 %v1207_v29, %s1715_s27  ;;  %v278_v56 = vsel %vm275_vm0, %v2062_v19, %v2070_v23 }
 0x225   : > { %v1209_v55 = vmul.f32 %v2360_v11, %v1204_v1  ;;  %v346_v1 = vsel %vm345_vm2, %v2096_v35, %v2094_v34  ;;  %v279_v35 = vsel %vm275_vm0, %v2070_v23, %v2080_v28  ;;  %v314_v23 = vsel %vm310_vm1, %v2092_v33, %v2663_v42 }
 0x226   : > { %v1208_v22 = vmul.f32 %v2354_v2, %v1203_v17  ;;  %v243_v9 = vstv %s242_s7  ;;  %v313_v17 = vsel %vm310_vm1, %v2085_v30, %v2092_v33  ;;  %v348_v30 = vsel %vm345_vm2, %v2100_v37, %v2098_v36 }
 0x227   : > { %v244_v49 = vmul.f32 %v2338_v48, %v243_v9  ;;  %v246_v14 = vmul.f32 %v2350_v16, %v243_v9  ;;  %v245_v63 = vmul.f32 %v2342_v25, %v243_v9  ;;  %v247_v5 = vmul.f32 %v2354_v2, %v243_v9 }
 0x228   : > { %1221 = vrot.lane.b32.xlu0 %v1208_v22, %s1715_s27  ;;  %1223 = vrot.lane.b32.xlu1 %v1209_v55, %s1715_s27  ;;  %s1439_s27 = sld [smem:[#allocation2 + $0x1c]] }
 0x22c   : > { %1261 = vrot.lane.b32.xlu0 %v1251_v3, %s1716_s25  ;;  %1263 = vrot.lane.b32.xlu1 %v1252_v53, %s1716_s25  ;;  %v416_v3 = vsel %vm415_vm4, %v2662_v38, %v2114_v44 }
 0x22e   : > { %v248_v11 = vstv %s1439_s27 }
 0x22f   : > { %v249_v40 = vadd.f32 %v248_v11, %v244_v49  ;;  %v251_v47 = vadd.f32 %v248_v11, %v246_v14  ;;  %v250_v60 = vadd.f32 %v248_v11, %v245_v63  ;;  %v252_v27 = vadd.f32 %v248_v11, %v247_v5  ;;  %v2668_v14 = vld [vmem:[#allocation15_spill] sm:$0xff] }
 0x230   : > { %1265 = vrot.lane.b32.xlu0 %v1253_v45, %s1716_s25  ;;  %1267 = vrot.lane.b32.xlu1 %v1254_v10, %s1716_s25  ;;  %v2664_v45 = vld [vmem:[#allocation16_spill] sm:$0xff]  ;;  %v2665_v10 = vld [vmem:[#allocation18_spill] sm:$0xff]  ;;  %v349_v33 = vsel %vm345_vm2, %v2098_v36, %v2668_v14 }
 0x231   : > { %v284_v59 = vadd.f32 %v276_v52, %v249_v40  ;;  %v286_v19 = vadd.f32 %v278_v56, %v251_v47  ;;  %v285_v24 = vadd.f32 %v277_v20, %v250_v60  ;;  %v287_v58 = vadd.f32 %v279_v35, %v252_v27  ;;  %v2670_v47 = vld [vmem:[#allocation20_spill] sm:$0xff]  ;;  %v2671_v56 = vld [vmem:[#allocation17_spill] sm:$0xff] }
 0x232   : > { %v382_v34 = vsel %vm380_vm3, %v2108_v41, %v2664_v45  ;;  %v383_v37 = vsel %vm380_vm3, %v2664_v45, %v2665_v10  ;;  %v2669_v41 = vld [vmem:[#allocation21_spill] sm:$0xff]  ;;  %v384_v20 = vsel %vm380_vm3, %v2665_v10, %v2671_v56 }
 0x233   : > { %v319_v4 = vadd.f32 %v311_v54, %v284_v59  ;;  %v320_v53 = vadd.f32 %v312_v13, %v285_v24  ;;  %v321_v28 = vadd.f32 %v313_v17, %v286_v19  ;;  %v322_v5 = vadd.f32 %v314_v23, %v287_v58  ;;  %v2673_v17 = vld [vmem:[#allocation27_spill] sm:$0xff] }
 0x234   : > { %1269 = vrot.lane.b32.xlu0 %v1255_v51, %s1716_s25  ;;  %v2667_v51 = vld [vmem:[#allocation22_spill] sm:$0xff]  ;;  %v417_v54 = vsel %vm415_vm4, %v2114_v44, %v2669_v41  ;;  %v418_v60 = vsel %vm415_vm4, %v2669_v41, %v2670_v47  ;;  %v2674_v24 = vld [vmem:[#allocation23_spill] sm:$0xff]  ;;  %s1473_s25 = sld [smem:[#allocation2 + $0x23]] }
 0x235   : > { %v354_v39 = vadd.f32 %v346_v1, %v319_v4  ;;  %v451_v9 = vsel %vm450_vm5, %v2667_v51, %v2666_v32  ;;  %v355_v49 = vadd.f32 %v347_v31, %v320_v53  ;;  %v356_v11 = vadd.f32 %v348_v30, %v321_v28  ;;  %v2672_v4 = vld [vmem:[#allocation24_spill] sm:$0xff] }
 0x236   : > { %v357_v27 = vadd.f32 %v349_v33, %v322_v5  ;;  %v452_v13 = vsel %vm450_vm5, %v2666_v32, %v2672_v4  ;;  %v453_v44 = vsel %vm450_vm5, %v2672_v4, %v2673_v17  ;;  %v419_v35 = vsel %vm415_vm4, %v2670_v47, %v2674_v24 }
 0x237   : > { %v389_v6 = vadd.f32 %v381_v0, %v354_v39  ;;  %v390_v59 = vadd.f32 %v382_v34, %v355_v49  ;;  %v391_v1 = vadd.f32 %v383_v37, %v356_v11 }
 0x238   : > { %v392_v30 = vadd.f32 %v384_v20, %v357_v27 }
 0x239   : > { %v424_v63 = vadd.f32 %v416_v3, %v389_v6  ;;  %v425_v0 = vadd.f32 %v417_v54, %v390_v59  ;;  %v426_v19 = vadd.f32 %v418_v60, %v391_v1  ;;  %v2675_v3 = vld [vmem:[#allocation26_spill] sm:$0xff] }
 0x23a   : > { %v454_v53 = vsel %vm450_vm5, %v2673_v17, %v2675_v3  ;;  %v427_v28 = vadd.f32 %v419_v35, %v392_v30  ;;  %v1284_v60 = vstv %s1473_s25  ;;  %v1717_v30 = vmov 0.0  }
 0x23b   : > { %v459_v36 = vadd.f32 %v451_v9, %v424_v63  ;;  %v460_v38 = vadd.f32 %v452_v13, %v425_v0  ;;  %v461_v42 = vadd.f32 %v453_v44, %v426_v19 }
 0x23c   : > { %v462_v10 = vadd.f32 %v454_v53, %v427_v28 }
 0x23d   : > { %v463_v23 = vmul.f32 %v2338_v48, %v459_v36  ;;  %v464_v32 = vmul.f32 %v2342_v25, %v460_v38  ;;  %v465_v51 = vmul.f32 %v2350_v16, %v461_v42 }
 0x23e   : > { %v466_v16 = vmul.f32 %v2354_v2, %v462_v10 }
 0x23f   : > { %v689_v58 = vadd.f32 %v2262_v61, %v463_v23  ;;  %v690_v49 = vadd.f32 %v2265_v43, %v464_v32 }
 0x262   : > { %v2424_v15 = vpop.permute.xlu1 %863  ;;  %v2426_v46 = vpop.permute.xlu0 %861 }
 0x263   : > { %v871_v6 = vsel %vm310_vm1, %v2426_v46, %v2424_v15 }
 0x264   : > { %v879_v48 = vadd.f32 %v871_v6, %v689_v58 }
 0x266   : > { %v2428_v18 = vpop.permute.xlu1 %867  ;;  %v2430_v57 = vpop.permute.xlu0 %865 }
 0x267   : > { %v872_v9 = vsel %vm310_vm1, %v2424_v15, %v2430_v57  ;;  %v873_v61 = vsel %vm310_vm1, %v2430_v57, %v2428_v18 }
 0x26a   : > { %v2434_v21 = vpop.permute.xlu0 %869 }
 0x26b   : > { %v874_v5 = vsel %vm310_vm1, %v2428_v18, %v2434_v21 }
 0x276   : > { %v2432_v26 = vpop.permute.xlu1 %1015  ;;  %v2437_v8 = vpop.permute.xlu0 %1017 }
 0x277   : > { %v1025_v37 = vsel %vm345_vm2, %v2432_v26, %v2437_v8  ;;  %v691_v26 = vadd.f32 %v2268_v62, %v465_v51  ;;  %v692_v62 = vadd.f32 %v2259_v50, %v466_v16 }
 0x278   : > { %v1033_v11 = vadd.f32 %v1025_v37, %v879_v48 }
 0x279   : > { %v881_v63 = vadd.f32 %v873_v61, %v691_v26 }
 0x27a   : > { %v2439_v7 = vpop.permute.xlu1 %1019  ;;  %v2450_v29 = vpop.permute.xlu0 %1021 }
 0x27b   : > { %v1026_v15 = vsel %vm345_vm2, %v2437_v8, %v2439_v7  ;;  %v1027_v57 = vsel %vm345_vm2, %v2439_v7, %v2450_v29 }
 0x27c   : > { %v1035_v54 = vadd.f32 %v1027_v57, %v881_v63 }
 0x27e   : > { %v2452_v12 = vpop.permute.xlu1 %1023 }
 0x27f   : > { %v1028_v50 = vsel %vm345_vm2, %v2450_v29, %v2452_v12 }
 0x28a   : > { %v2475_v55 = vpop.permute.xlu1 %1135  ;;  %v1134_v22 = vpop.permute.xlu0 %1133 }
 0x28b   : > { %v1143_v46 = vsel %vm380_vm3, %v1134_v22, %v2475_v55  ;;  %v880_v22 = vadd.f32 %v872_v9, %v690_v49 }
 0x28c   : > { %v1151_v43 = vadd.f32 %v1143_v46, %v1033_v11 }
 0x28d   : > { %v1034_v41 = vadd.f32 %v1026_v15, %v880_v22 }
 0x28e   : > { %v2501_v40 = vpop.permute.xlu1 %1139  ;;  %v1138_v52 = vpop.permute.xlu0 %1137 }
 0x28f   : > { %v1144_v2 = vsel %vm380_vm3, %v2475_v55, %v1138_v52  ;;  %v1145_v8 = vsel %vm380_vm3, %v1138_v52, %v2501_v40  ;;  %v882_v55 = vadd.f32 %v874_v5, %v692_v62 }
 0x290   : > { %v1152_v20 = vadd.f32 %v1144_v2, %v1034_v41  ;;  %v1153_v1 = vadd.f32 %v1145_v8, %v1035_v54 }
 0x291   : > { %v1036_v27 = vadd.f32 %v1028_v50, %v882_v55 }
 0x292   : > { %v1216_v39 = vpop.permute.xlu1 %1215  ;;  %v1142_v31 = vpop.permute.xlu0 %1141 }
 0x293   : > { %v1146_v36 = vsel %vm380_vm3, %v2501_v40, %v1142_v31 }
 0x294   : > { %v1154_v24 = vadd.f32 %v1146_v36, %v1036_v27 }
 0x296   : > { %v1220_v45 = vpop.permute.xlu1 %1219  ;;  %v1218_v34 = vpop.permute.xlu0 %1217 }
 0x297   : > { %v1225_v33 = vsel %vm415_vm4, %v1216_v39, %v1218_v34  ;;  %v1226_v56 = vsel %vm415_vm4, %v1218_v34, %v1220_v45 }
 0x298   : > { %v1233_v7 = vadd.f32 %v1225_v33, %v1151_v43  ;;  %v1234_v4 = vadd.f32 %v1226_v56, %v1152_v20 }
 0x29a   : > { %v1224_v25 = vpop.permute.xlu1 %1223  ;;  %v1222_v14 = vpop.permute.xlu0 %1221 }
 0x29b   : > { %v1227_v18 = vsel %vm415_vm4, %v1220_v45, %v1222_v14  ;;  %v1228_v12 = vsel %vm415_vm4, %v1222_v14, %v1224_v25 }
 0x29c   : > { %v1235_v13 = vadd.f32 %v1227_v18, %v1153_v1  ;;  %v1236_v31 = vadd.f32 %v1228_v12, %v1154_v24 }
 0x29e   : > { %v1264_v47 = vpop.permute.xlu1 %1263  ;;  %v1262_v59 = vpop.permute.xlu0 %1261 }
 0x29f   : > { %v1271_v21 = vsel %vm450_vm5, %v1262_v59, %v1264_v47 }
 0x2a0   : > { %v1279_v52 = vadd.f32 %v1271_v21, %v1233_v7 }
 0x2a2   : > { %v1285_v17 = vadd.f32 %v1284_v60, %v1279_v52  ;;  %v1268_v44 = vpop.permute.xlu1 %1267  ;;  %v1266_v29 = vpop.permute.xlu0 %1265 }
 0x2a3   : > { %v1272_v0 = vsel %vm450_vm5, %v1264_v47, %v1266_v29  ;;  %v1273_v19 = vsel %vm450_vm5, %v1266_v29, %v1268_v44 }
 0x2a4   : > { %vm1289_vm6 = vcmp.gt.f32.partialorder %v1285_v17, 0.0  ;;  %v1280_v35 = vadd.f32 %v1272_v0, %v1234_v4  ;;  %v1281_v39 = vadd.f32 %v1273_v19, %v1235_v13 }
 0x2a5   : > { %v1474_v40 = vsel %vm1289_vm6, 1.0, %v1717_v30 }
 0x2a6   : > { %1301 = vst [vmem:[%s235_s26] sm:$0xff] %v1474_v40  ;;  %v1286_v38 = vadd.f32 %v1284_v60, %v1280_v35  ;;  %v1287_v3 = vadd.f32 %v1284_v60, %v1281_v39  ;;  %v1270_v53 = vpop.permute.xlu0 %1269 }
 0x2a7   : > { %v1274_v42 = vsel %vm450_vm5, %v1268_v44, %v1270_v53 }
 0x2a8   : > { %vm1290_vm7 = vcmp.gt.f32.partialorder %v1286_v38, 0.0  ;;  %vm1291_vm8 = vcmp.gt.f32.partialorder %v1287_v3, 0.0  ;;  %v1282_v23 = vadd.f32 %v1274_v42, %v1236_v31 }
 0x2a9   : > { %v1475_v28 = vsel %vm1290_vm7, 1.0, %v1717_v30  ;;  %v1476_v6 = vsel %vm1291_vm8, 1.0, %v1717_v30 }
 0x2aa   : > { %1302 = vst [vmem:[%s235_s26 + $0x8] sm:$0xff] %v1475_v28  ;;  %1303 = vst [vmem:[%s235_s26 + $0x10] sm:$0xff] %v1476_v6  ;;  %v1288_v58 = vadd.f32 %v1284_v60, %v1282_v23 }
 0x2ac   : > { %vm1292_vm9 = vcmp.gt.f32.partialorder %v1288_v58, 0.0 }
 0x2ad   : > { %v1477_v45 = vsel %vm1292_vm9, 1.0, %v1717_v30 }
 0x2ae   : > { %1304 = vst [vmem:[%s235_s26 + $0x18] sm:$0xff] %v1477_v45 }
 0x2af   : > { %1645 = shalt.err (!%p1642_p6)
}
 0x2b0   : > { %s1646_s28 = scalar_lea.hbm %s2578_s17, 512  ;;  %s1650_s19 = scalar_lea.hbm %s2625_s3, 1024 }
 0x2b1   : > { %p1647_p12 = scmp.ne.s32.totalorder %s2578_s17, %s1646_s28  ;;  %p1651_p2 = scmp.lt.u32.totalorder %s2578_s17, %s2625_s3 }
 0x2b2   : > { %p1652_p9 = scmp.lt.u32.totalorder %s1650_s19, %s1646_s28  ;;  %p1654_p0 = scmp.lt.u32.totalorder %s1646_s28, %s2578_s17 }
 0x2b3   : > { %p1648_p13 = pnand %p1647_p12, %p2676_p8 }
 0x2b4   : > { %p1653_p11 = por %p1652_p9, %p1651_p2 }
 0x2b5   : > { %p1649_p10 = pneg %p1648_p13 }
 0x2b6   : > { %p1655_p7 = por %p1654_p0, %p1653_p11 }
 0x2b8   : > { %p1656_p3 = pnand %p1655_p7, %p1649_p10 }
 0x2ba   : > { %1659 = shalt.err (!%p1656_p3)
}
 0x2bb   : > { %1493 = dma.vmem_to_hbm [thread:$0]  (%p2676_p8), %s2580_s6, 512, %s2578_s17, %s1306_s20  }
 0x2bc PF: > { %s1332_s27 = sand.u32 1, %s1694_s12   ;;  %p2677_p1 = scmp.ne.s32.totalorder %s2639_s24, 0 }
 0x2bd   : > { %p2678_p4 = scmp.ge.s32.totalorder %s1706_s15, 2  ;;  %s1333_s25 = scalar_lea.sflag [#allocation4], %s1332_s27 }
 0x2bf   : > { %p1507_p5 = pnand %p2678_p4, %p2677_p1 }
 0x2c1   : > { %1689 = dma.done.wait (!%p1507_p5), %s1333_s25, 512  }
 0x2c2   : > { %1691 = vsyncadd (!%p1507_p5), %s1333_s25, 4294966784  ;;  %p20_p6 = scmp.ge.s32.totalorder %s1764_s18, 4   ;;  %s2679_s12 = smov %s1698_s13 }
 0x2c3   : > { %s2680_s13 = smov %s1702_s14  ;;  %s2681_s14 = smov %s1776_s21 }
 0x2c4   : > { %s2682_s15 = smov %s1764_s18  ;;  %22 = sbr.rel (!%p20_p6) target bundleno = 8 (0x8), region = 95 }
 0x2cb   :  { %1338 = vsyncpa [#allocation3], 1 }
 0x2cc   :  { %1340 = vsyncpa [#allocation3 + $0x1], 1 }
 0x2cd   :  { %1341 = vsyncpa [#allocation8], 1 }
 0x2ce   :  { %1343 = vsyncpa [#allocation8 + $0x1], 1 }
 0x2cf   :  { %1344 = vsyncpa [#allocation4], 1 }
 0x2d0   :  { %1346 = vsyncpa [#allocation4 + $0x1], 1 }
 0x2d1   :  { %1347 = vsyncpa [#allocation5], 1 }
 0x2d2   :  { %1349 = vsyncpa [#allocation5 + $0x1], 1 }

</bundles_post_ra>
